<compile_context>
chip_gen: v5e
topology: v5e:2x2
jax: 0.10.0
libtpu: 0.0.40
codegen_flags: <defaults>
</compile_context>

<pallas_src>
import math

import jax
import jax.numpy as jnp
from jax import lax
from jax.experimental import pallas as pl
from jax.experimental.pallas import tpu as pltpu


# ----------------------------- kernel helpers ------------------------------

def _layer_norm(v, gamma, beta, eps=1e-5):
    # One-pass LayerNorm: the two reductions are independent (shorter XLU
    # critical path than mean -> subtract -> square -> reduce).
    mu = jnp.mean(v, axis=-1, keepdims=True)
    ms = jnp.mean(v * v, axis=-1, keepdims=True)
    var = jnp.maximum(ms - mu * mu, 0.0)
    return (v - mu) * lax.rsqrt(var + eps) * gamma + beta


def _softmax(s):
    # Exact softmax in f32 (the approx reciprocal compounded across layers
    # and broke the numerical check).
    m = jnp.max(s, axis=-1, keepdims=True)
    e = jnp.exp(s - m)
    return e / jnp.sum(e, axis=-1, keepdims=True)


# ------------------------------- the kernel --------------------------------

def fused_decoder_kernel(x_ref, mem_ref, tbias_ref, sbias_ref,
                         attn_w_ref, attn_b_ref, ff_w_ref, ff_b_ref, ln_ref,
                         o_ref):
    f32 = jnp.float32
    cdt = attn_w_ref.dtype                  # MXU operand dtype (bf16 or f32)

    TB, St, D = x_ref.shape
    Ss = mem_ref.shape[1]
    L = attn_w_ref.shape[0]
    dk = attn_w_ref.shape[-1]

    x0 = x_ref[...].astype(f32)             # (TB, St, D) activation carry
    mem_c = mem_ref[...].astype(cdt)        # (TB, Ss, D) value / K-proj operand
    mem_flat = mem_c.reshape(TB * Ss, D)
    t_bias = tbias_ref[...].astype(f32)     # (TB, St, St) additive mask bias
    s_bias = sbias_ref[...].astype(f32)     # (TB, St, Ss)

    def project(flat_c, w, b, rows):
        # (TB*rows, D) @ (D, dk) + (1, dk); f32 accumulation on the MXU.
        y = jnp.dot(flat_c, w, preferred_element_type=f32) + b
        return y.reshape(TB, rows, dk)

    def attend(q, k, v_c, bias):
        # q, k: (TB, Sq, dk) f32; v_c: (TB, Skv, D) cdt; bias: (TB, Sq, Skv).
        # 1/sqrt(dk) is pre-folded into the Q weights/biases at pack time.
        s = jnp.einsum('bqd,bkd->bqk', q.astype(cdt), k.astype(cdt),
                       preferred_element_type=f32) + bias
        p = _softmax(s)
        return jnp.einsum('bqk,bkd->bqd', p.astype(cdt), v_c,
                          preferred_element_type=f32)

    def layer_body(l, x):
        aw = attn_w_ref[l]                  # (4, D, dk)  [sa_q, sa_k, ca_q, ca_k]
        ab = attn_b_ref[l]                  # (4, 1, dk)  (f32)
        w_ff = ff_w_ref[l]                  # (D, D)
        b_ff = ff_b_ref[l]                  # (1, D)      (f32)
        lnp = ln_ref[l]                     # (6, 1, D)   (f32)

        # ---- self attention: x = self_attn(x, x, x, tgt) + x; norm_1 ----
        xc = x.astype(cdt)
        xf = xc.reshape(TB * St, D)
        q = project(xf, aw[0], ab[0], St)
        k = project(xf, aw[1], ab[1], St)
        x = _layer_norm(attend(q, k, xc, t_bias) + x, lnp[0], lnp[1])

        # ---- src attention: x = src_attn(x, m, m, src) + x; norm_2 ----
        xc = x.astype(cdt)
        xf = xc.reshape(TB * St, D)
        q = project(xf, aw[2], ab[2], St)
        k = project(mem_flat, aw[3], ab[3], Ss)
        x = _layer_norm(attend(q, k, mem_c, s_bias) + x, lnp[2], lnp[3])

        # ---- positionwise FF: x = relu(x @ W + b) + x; norm_3 ----
        xf = x.astype(cdt).reshape(TB * St, D)
        h = jnp.maximum(jnp.dot(xf, w_ff, preferred_element_type=f32) + b_ff,
                        0.0)
        x = _layer_norm(h.reshape(TB, St, D) + x, lnp[4], lnp[5])
        return x

    y = lax.fori_loop(0, L, layer_body, x0, unroll=True)
    o_ref[...] = y.astype(o_ref.dtype)


# --------------------------- packing / wrappers -----------------------------

def pack_decoder_params(layer_params, compute_dtype=jnp.bfloat16):
    """One-time parameter packing (call OUTSIDE the per-step jitted path)."""
    dk = layer_params[0]['sa_wq'].shape[1]
    inv = 1.0 / math.sqrt(dk)               # fold attention scale into Q proj
    attn_w = jnp.stack([
        jnp.stack([p['sa_wq'] * inv, p['sa_wk'],
                   p['ca_wq'] * inv, p['ca_wk']], axis=0)
        for p in layer_params], axis=0).astype(compute_dtype)       # (L,4,D,dk)
    attn_b = jnp.stack([
        jnp.stack([p['sa_bq'] * inv, p['sa_bk'],
                   p['ca_bq'] * inv, p['ca_bk']], axis=0)
        for p in layer_params], axis=0).astype(jnp.float32)         # (L,4,1,dk)
    ff_w = jnp.stack([p['ff_w'] for p in layer_params],
                     axis=0).astype(compute_dtype)                  # (L,D,D)
    ff_b = jnp.stack([p['ff_b'] for p in layer_params],
                     axis=0).astype(jnp.float32)                    # (L,1,D)
    ln = jnp.stack([
        jnp.stack([p['n1_g'], p['n1_b'], p['n2_g'], p['n2_b'],
                   p['n3_g'], p['n3_b']], axis=0)
        for p in layer_params], axis=0).astype(jnp.float32)         # (L,6,1,D)
    return {'attn_w': attn_w, 'attn_b': attn_b, 'ff_w': ff_w,
            'ff_b': ff_b, 'ln': ln}


def masks_to_bias(mask):
    """int mask (nonzero = keep) -> additive f32 bias (0 keep / -1e9 masked)."""
    return jnp.where(mask == 0, -1e9, 0.0).astype(jnp.float32)


def decoder_forward(x, memory, tgt_bias, src_bias, packed, *, batch_tile=1):
    """Decoder.forward: all N DecoderLayers fused into a single pallas_call."""
    B, St, D = x.shape
    Ss = memory.shape[1]
    TB = batch_tile
    assert B % TB == 0, "batch_tile must divide batch"

    def tile_spec(s1, s2):
        # Batch-tiled blocks, indexed by batch tile only.
        return pl.BlockSpec((TB, s1, s2), lambda b: (b, 0, 0))

    def resident_spec(arr):
        # Full parameter slab with a constant block index: DMA'd once and kept
        # VMEM-resident across all grid steps and all layers.
        zeros = (0,) * arr.ndim
        return pl.BlockSpec(arr.shape, lambda b: zeros)

    return pl.pallas_call(
        fused_decoder_kernel,
        out_shape=jax.ShapeDtypeStruct((B, St, D), x.dtype),
        grid_spec=pltpu.PrefetchScalarGridSpec(
            num_scalar_prefetch=0,
            grid=(B // TB,),
            in_specs=[tile_spec(St, D),               # x
                      tile_spec(Ss, D),               # memory
                      tile_spec(St, St),              # tgt additive bias
                      tile_spec(St, Ss),              # src additive bias
                      resident_spec(packed['attn_w']),
                      resident_spec(packed['attn_b']),
                      resident_spec(packed['ff_w']),
                      resident_spec(packed['ff_b']),
                      resident_spec(packed['ln'])],
            out_specs=tile_spec(St, D)),
        compiler_params=pltpu.CompilerParams(
            dimension_semantics=("parallel",),
            vmem_limit_bytes=48 * 1024 * 1024),
    )(x, memory, tgt_bias, src_bias,
      packed['attn_w'], packed['attn_b'], packed['ff_w'], packed['ff_b'],
      packed['ln'])


# --------------------------- pure-JAX reference ----------------------------

def _ref_attention(q_in, kv_in, v_in, mask, wq, bq, wk, bk):
    d_k = wq.shape[-1]
    q = q_in @ wq + bq
    k = kv_in @ wk + bk
    scores = jnp.einsum('bqd,bkd->bqk', q, k) / math.sqrt(d_k)
    scores = jnp.where(mask == 0, -1e9, scores)
    p = jax.nn.softmax(scores, axis=-1)
    return jnp.einsum('bqk,bkd->bqd', p, v_in)


def _ref_layer_norm(x, g, b, eps=1e-5):
    mu = jnp.mean(x, axis=-1, keepdims=True)
    var = jnp.mean(jnp.square(x - mu), axis=-1, keepdims=True)
    return (x - mu) / jnp.sqrt(var + eps) * g + b


def decoder_reference(x, memory, tgt_mask, src_mask, layer_params):
    for p in layer_params:
        x = _ref_attention(x, x, x, tgt_mask,
                           p['sa_wq'], p['sa_bq'], p['sa_wk'], p['sa_bk']) + x
        x = _ref_layer_norm(x, p['n1_g'], p['n1_b'])
        x = _ref_attention(x, memory, memory, src_mask,
                           p['ca_wq'], p['ca_bq'], p['ca_wk'], p['ca_bk']) + x
        x = _ref_layer_norm(x, p['n2_g'], p['n2_b'])
        x = jnp.maximum(x @ p['ff_w'] + p['ff_b'], 0.0) + x
        x = _ref_layer_norm(x, p['n3_g'], p['n3_b'])
    return x


# ------------------------------ param init ---------------------------------

def init_decoder_params(key, N, d_model, d_k):
    def uni(k, shape, fan_in):
        bound = 1.0 / math.sqrt(fan_in)
        return jax.random.uniform(k, shape, jnp.float32, -bound, bound)

    layers = []
    for _ in range(N):
        key, *ks = jax.random.split(key, 11)
        layers.append({
            'sa_wq': uni(ks[0], (d_model, d_k), d_model),
            'sa_bq': uni(ks[1], (1, d_k), d_model),
            'sa_wk': uni(ks[2], (d_model, d_k), d_model),
            'sa_bk': uni(ks[3], (1, d_k), d_model),
            'ca_wq': uni(ks[4], (d_model, d_k), d_model),
            'ca_bq': uni(ks[5], (1, d_k), d_model),
            'ca_wk': uni(ks[6], (d_model, d_k), d_model),
            'ca_bk': uni(ks[7], (1, d_k), d_model),
            'ff_w':  uni(ks[8], (d_model, d_model), d_model),
            'ff_b':  uni(ks[9], (1, d_model), d_model),
            'n1_g': jnp.ones((1, d_model), jnp.float32),
            'n1_b': jnp.zeros((1, d_model), jnp.float32),
            'n2_g': jnp.ones((1, d_model), jnp.float32),
            'n2_b': jnp.zeros((1, d_model), jnp.float32),
            'n3_g': jnp.ones((1, d_model), jnp.float32),
            'n3_b': jnp.zeros((1, d_model), jnp.float32),
        })
    return layers


# ---------------------------------- main ------------------------------------

if __name__ == "__main__":
    key = jax.random.PRNGKey(0)
    N_layers = 2
    B, S_tgt, S_src, d_model, d_k = 2, 8, 8, 32, 16

    k_x, k_m, k_p = jax.random.split(key, 3)
    x = jax.random.normal(k_x, (B, S_tgt, d_model), dtype=jnp.float32)
    memory = jax.random.normal(k_m, (B, S_src, d_model), dtype=jnp.float32)

    # tgt_mask: causal (subsequent) mask; src_mask: all positions valid.
    tgt_mask = jnp.broadcast_to(
        jnp.tril(jnp.ones((S_tgt, S_tgt), jnp.int32)), (B, S_tgt, S_tgt))
    src_mask = jnp.ones((B, S_tgt, S_src), jnp.int32)

    layer_params = init_decoder_params(k_p, N_layers, d_model, d_k)

    # One-time prep outside the jitted per-call path (mask -> bias, packing).
    tgt_bias = masks_to_bias(tgt_mask)
    src_bias = masks_to_bias(src_mask)

    fwd = jax.jit(decoder_forward, static_argnames=("batch_tile",))
    ref = decoder_reference(x, memory, tgt_mask, src_mask, layer_params)

    # ---- f32 compute path: tight check of the kernel logic ----
    packed_f32 = pack_decoder_params(layer_params, compute_dtype=jnp.float32)
    out_f32 = jax.block_until_ready(
        fwd(x, memory, tgt_bias, src_bias, packed_f32, batch_tile=1))
    assert out_f32.shape == (B, S_tgt, d_model)
    # Tolerance covers TPU default-precision f32 matmuls in the XLA reference.
    assert jnp.allclose(out_f32, ref, rtol=3e-2, atol=3e-2), \
        "Pallas (f32) output mismatch vs JAX reference"

    # ---- bf16 MXU-operand path (f32 accumulation, f32 softmax/LayerNorm) ----
    packed_bf16 = pack_decoder_params(layer_params, compute_dtype=jnp.bfloat16)
    out_bf16 = jax.block_until_ready(
        fwd(x, memory, tgt_bias, src_bias, packed_bf16, batch_tile=2))
    assert out_bf16.shape == (B, S_tgt, d_model)
    # Looser tolerance: bf16-rounded weights/activations vs f32 reference.
    assert jnp.allclose(out_bf16, ref, rtol=1e-1, atol=1e-1), \
        "Pallas (bf16) output mismatch vs JAX reference"

    print("KERNEL_OK")
</pallas_src>

<mosaic_0001>
module attributes {stable_mosaic.version = 11 : i64} {
  func.func @fused_decoder_kernel(%arg0: i32, %arg1: memref<1x8x32xf32, #tpu.memory_space<vmem>>, %arg2: memref<1x8x32xf32, #tpu.memory_space<vmem>>, %arg3: memref<1x8x8xf32, #tpu.memory_space<vmem>>, %arg4: memref<1x8x8xf32, #tpu.memory_space<vmem>>, %arg5: memref<2x4x32x16xf32, #tpu.memory_space<vmem>>, %arg6: memref<2x4x1x16xf32, #tpu.memory_space<vmem>>, %arg7: memref<2x32x32xf32, #tpu.memory_space<vmem>>, %arg8: memref<2x1x32xf32, #tpu.memory_space<vmem>>, %arg9: memref<2x6x1x32xf32, #tpu.memory_space<vmem>>, %arg10: memref<1x8x32xf32, #tpu.memory_space<vmem>>) attributes {dimension_semantics = [#tpu.dimension_semantics<parallel>], iteration_bounds = array<i64: 2>, scalar_prefetch = 0 : i64, scratch_operands = 0 : i64, tpu.core_type = #tpu.core_type<tc>, window_params = [{transform_indices = @transform_0, window_bounds = array<i64: 1, 8, 32>}, {transform_indices = @transform_1, window_bounds = array<i64: 1, 8, 32>}, {transform_indices = @transform_2, window_bounds = array<i64: 1, 8, 8>}, {transform_indices = @transform_3, window_bounds = array<i64: 1, 8, 8>}, {pipeline_mode = #tpu.pipeline_mode<synchronous>, transform_indices = @transform_4, window_bounds = array<i64: 2, 4, 32, 16>}, {pipeline_mode = #tpu.pipeline_mode<synchronous>, transform_indices = @transform_5, window_bounds = array<i64: 2, 4, 1, 16>}, {pipeline_mode = #tpu.pipeline_mode<synchronous>, transform_indices = @transform_6, window_bounds = array<i64: 2, 32, 32>}, {pipeline_mode = #tpu.pipeline_mode<synchronous>, transform_indices = @transform_7, window_bounds = array<i64: 2, 1, 32>}, {pipeline_mode = #tpu.pipeline_mode<synchronous>, transform_indices = @transform_8, window_bounds = array<i64: 2, 6, 1, 32>}, {transform_indices = @transform_9, window_bounds = array<i64: 1, 8, 32>}]} {
    %c0 = arith.constant 0 : index
    %c0_0 = arith.constant 0 : index
    %c0_1 = arith.constant 0 : index
    %0 = vector.load %arg1[%c0, %c0_0, %c0_1] : memref<1x8x32xf32, #tpu.memory_space<vmem>>, vector<1x8x32xf32>
    %c0_2 = arith.constant 0 : index
    %c0_3 = arith.constant 0 : index
    %c0_4 = arith.constant 0 : index
    %1 = vector.load %arg2[%c0_2, %c0_3, %c0_4] : memref<1x8x32xf32, #tpu.memory_space<vmem>>, vector<1x8x32xf32>
    %2 = vector.shape_cast %1 : vector<1x8x32xf32> to vector<8x32xf32>
    %c0_5 = arith.constant 0 : index
    %c0_6 = arith.constant 0 : index
    %c0_7 = arith.constant 0 : index
    %3 = vector.load %arg3[%c0_5, %c0_6, %c0_7] : memref<1x8x8xf32, #tpu.memory_space<vmem>>, vector<1x8x8xf32>
    %c0_8 = arith.constant 0 : index
    %c0_9 = arith.constant 0 : index
    %c0_10 = arith.constant 0 : index
    %4 = vector.load %arg4[%c0_8, %c0_9, %c0_10] : memref<1x8x8xf32, #tpu.memory_space<vmem>>, vector<1x8x8xf32>
    %c0_i32 = arith.constant 0 : i32
    %5 = arith.index_cast %c0_i32 : i32 to index
    %c0_11 = arith.constant 0 : index
    %c0_12 = arith.constant 0 : index
    %c0_13 = arith.constant 0 : index
    %6 = vector.load %arg5[%5, %c0_11, %c0_12, %c0_13] : memref<2x4x32x16xf32, #tpu.memory_space<vmem>>, vector<1x4x32x16xf32>
    %7 = vector.shape_cast %6 : vector<1x4x32x16xf32> to vector<4x32x16xf32>
    %8 = arith.index_cast %c0_i32 : i32 to index
    %c0_14 = arith.constant 0 : index
    %c0_15 = arith.constant 0 : index
    %c0_16 = arith.constant 0 : index
    %9 = vector.load %arg6[%8, %c0_14, %c0_15, %c0_16] : memref<2x4x1x16xf32, #tpu.memory_space<vmem>>, vector<1x4x1x16xf32>
    %10 = vector.shape_cast %9 : vector<1x4x1x16xf32> to vector<4x1x16xf32>
    %11 = arith.index_cast %c0_i32 : i32 to index
    %c0_17 = arith.constant 0 : index
    %c0_18 = arith.constant 0 : index
    %12 = vector.load %arg7[%11, %c0_17, %c0_18] : memref<2x32x32xf32, #tpu.memory_space<vmem>>, vector<1x32x32xf32>
    %13 = vector.shape_cast %12 : vector<1x32x32xf32> to vector<32x32xf32>
    %14 = arith.index_cast %c0_i32 : i32 to index
    %c0_19 = arith.constant 0 : index
    %c0_20 = arith.constant 0 : index
    %15 = vector.load %arg8[%14, %c0_19, %c0_20] : memref<2x1x32xf32, #tpu.memory_space<vmem>>, vector<1x1x32xf32>
    %16 = vector.shape_cast %15 : vector<1x1x32xf32> to vector<1x32xf32>
    %17 = arith.index_cast %c0_i32 : i32 to index
    %c0_21 = arith.constant 0 : index
    %c0_22 = arith.constant 0 : index
    %c0_23 = arith.constant 0 : index
    %18 = vector.load %arg9[%17, %c0_21, %c0_22, %c0_23] : memref<2x6x1x32xf32, #tpu.memory_space<vmem>>, vector<1x6x1x32xf32>
    %19 = vector.shape_cast %18 : vector<1x6x1x32xf32> to vector<6x1x32xf32>
    %20 = vector.shape_cast %0 : vector<1x8x32xf32> to vector<8x32xf32>
    %21 = vector.extract_strided_slice %7 {offsets = [0, 0, 0], sizes = [1, 32, 16], strides = [1, 1, 1]} : vector<4x32x16xf32> to vector<1x32x16xf32>
    %22 = vector.shape_cast %21 : vector<1x32x16xf32> to vector<32x16xf32>
    %23 = vector.extract_strided_slice %10 {offsets = [0, 0, 0], sizes = [1, 1, 16], strides = [1, 1, 1]} : vector<4x1x16xf32> to vector<1x1x16xf32>
    %24 = vector.shape_cast %23 : vector<1x1x16xf32> to vector<1x16xf32>
    %cst = arith.constant dense<0.000000e+00> : vector<8x16xf32>
    %25 = tpu.matmul %20, %22, %cst {dimension_numbers = #tpu.dot_dimension_numbers<[1], [0], [0], [1], [0, 0, 1, 1], [], []>} : vector<8x32xf32>, vector<32x16xf32>, vector<8x16xf32> -> vector<8x16xf32>
    %26 = vector.broadcast %24 : vector<1x16xf32> to vector<8x16xf32>
    %27 = arith.addf %25, %26 : vector<8x16xf32>
    %28 = vector.shape_cast %27 : vector<8x16xf32> to vector<1x8x16xf32>
    %29 = vector.extract_strided_slice %7 {offsets = [1, 0, 0], sizes = [1, 32, 16], strides = [1, 1, 1]} : vector<4x32x16xf32> to vector<1x32x16xf32>
    %30 = vector.shape_cast %29 : vector<1x32x16xf32> to vector<32x16xf32>
    %31 = vector.extract_strided_slice %10 {offsets = [1, 0, 0], sizes = [1, 1, 16], strides = [1, 1, 1]} : vector<4x1x16xf32> to vector<1x1x16xf32>
    %32 = vector.shape_cast %31 : vector<1x1x16xf32> to vector<1x16xf32>
    %cst_24 = arith.constant dense<0.000000e+00> : vector<8x16xf32>
    %33 = tpu.matmul %20, %30, %cst_24 {dimension_numbers = #tpu.dot_dimension_numbers<[1], [0], [0], [1], [0, 0, 1, 1], [], []>} : vector<8x32xf32>, vector<32x16xf32>, vector<8x16xf32> -> vector<8x16xf32>
    %34 = vector.broadcast %32 : vector<1x16xf32> to vector<8x16xf32>
    %35 = arith.addf %33, %34 : vector<8x16xf32>
    %36 = vector.shape_cast %35 : vector<8x16xf32> to vector<1x8x16xf32>
    "tpu.trace_start"() <{level = 10 : i32, message = "bqd,bkd->bqk"}> : () -> ()
    %cst_25 = arith.constant dense<0.000000e+00> : vector<1x8x8xf32>
    %37 = tpu.matmul %28, %36, %cst_25 {dimension_numbers = #tpu.dot_dimension_numbers<[2], [2], [1], [1], [0, 0, 0, 1, 1, 1], [0], [0]>} : vector<1x8x16xf32>, vector<1x8x16xf32>, vector<1x8x8xf32> -> vector<1x8x8xf32>
    "tpu.trace_stop"() : () -> ()
    %38 = arith.addf %37, %3 : vector<1x8x8xf32>
    %cst_26 = arith.constant dense<0xFF800000> : vector<1x8xf32>
    %39 = vector.multi_reduction <maximumf>, %38, %cst_26 [2] : vector<1x8x8xf32> to vector<1x8xf32>
    %40 = vector.shape_cast %39 : vector<1x8xf32> to vector<1x8x1xf32>
    %41 = vector.broadcast %40 : vector<1x8x1xf32> to vector<1x8x8xf32>
    %42 = arith.subf %38, %41 : vector<1x8x8xf32>
    %43 = math.exp %42 : vector<1x8x8xf32>
    %cst_27 = arith.constant dense<0.000000e+00> : vector<1x8xf32>
    %44 = vector.multi_reduction <add>, %43, %cst_27 [2] : vector<1x8x8xf32> to vector<1x8xf32>
    %45 = vector.shape_cast %44 : vector<1x8xf32> to vector<1x8x1xf32>
    %46 = vector.broadcast %45 : vector<1x8x1xf32> to vector<1x8x8xf32>
    %47 = arith.divf %43, %46 : vector<1x8x8xf32>
    "tpu.trace_start"() <{level = 10 : i32, message = "bqk,bkd->bqd"}> : () -> ()
    %cst_28 = arith.constant dense<0.000000e+00> : vector<1x8x32xf32>
    %48 = tpu.matmul %47, %0, %cst_28 {dimension_numbers = #tpu.dot_dimension_numbers<[2], [1], [1], [2], [0, 0, 0, 1, 1, 2], [0], [0]>} : vector<1x8x8xf32>, vector<1x8x32xf32>, vector<1x8x32xf32> -> vector<1x8x32xf32>
    "tpu.trace_stop"() : () -> ()
    %49 = arith.addf %48, %0 : vector<1x8x32xf32>
    %50 = vector.extract_strided_slice %19 {offsets = [0, 0, 0], sizes = [1, 1, 32], strides = [1, 1, 1]} : vector<6x1x32xf32> to vector<1x1x32xf32>
    %51 = vector.shape_cast %50 : vector<1x1x32xf32> to vector<1x32xf32>
    %52 = vector.extract_strided_slice %19 {offsets = [1, 0, 0], sizes = [1, 1, 32], strides = [1, 1, 1]} : vector<6x1x32xf32> to vector<1x1x32xf32>
    %53 = vector.shape_cast %52 : vector<1x1x32xf32> to vector<1x32xf32>
    %cst_29 = arith.constant dense<0.000000e+00> : vector<1x8xf32>
    %54 = vector.multi_reduction <add>, %49, %cst_29 [2] : vector<1x8x32xf32> to vector<1x8xf32>
    %55 = vector.shape_cast %54 : vector<1x8xf32> to vector<1x8x1xf32>
    %cst_30 = arith.constant 3.200000e+01 : f32
    %56 = vector.broadcast %cst_30 : f32 to vector<1x8x1xf32>
    %57 = arith.divf %55, %56 : vector<1x8x1xf32>
    %58 = arith.mulf %49, %49 : vector<1x8x32xf32>
    %cst_31 = arith.constant dense<0.000000e+00> : vector<1x8xf32>
    %59 = vector.multi_reduction <add>, %58, %cst_31 [2] : vector<1x8x32xf32> to vector<1x8xf32>
    %60 = vector.shape_cast %59 : vector<1x8xf32> to vector<1x8x1xf32>
    %cst_32 = arith.constant 3.200000e+01 : f32
    %61 = vector.broadcast %cst_32 : f32 to vector<1x8x1xf32>
    %62 = arith.divf %60, %61 : vector<1x8x1xf32>
    %63 = arith.mulf %57, %57 : vector<1x8x1xf32>
    %64 = arith.subf %62, %63 : vector<1x8x1xf32>
    %cst_33 = arith.constant 0.000000e+00 : f32
    %65 = vector.broadcast %cst_33 : f32 to vector<1x8x1xf32>
    %66 = arith.maximumf %64, %65 : vector<1x8x1xf32>
    %67 = vector.broadcast %57 : vector<1x8x1xf32> to vector<1x8x32xf32>
    %68 = arith.subf %49, %67 : vector<1x8x32xf32>
    %cst_34 = arith.constant 9.99999974E-6 : f32
    %69 = vector.broadcast %cst_34 : f32 to vector<1x8x1xf32>
    %70 = arith.addf %66, %69 : vector<1x8x1xf32>
    %71 = math.rsqrt %70 : vector<1x8x1xf32>
    %72 = vector.broadcast %71 : vector<1x8x1xf32> to vector<1x8x32xf32>
    %73 = arith.mulf %68, %72 : vector<1x8x32xf32>
    %74 = vector.shape_cast %51 : vector<1x32xf32> to vector<1x1x32xf32>
    %75 = vector.broadcast %74 : vector<1x1x32xf32> to vector<1x8x32xf32>
    %76 = arith.mulf %73, %75 : vector<1x8x32xf32>
    %77 = vector.shape_cast %53 : vector<1x32xf32> to vector<1x1x32xf32>
    %78 = vector.broadcast %77 : vector<1x1x32xf32> to vector<1x8x32xf32>
    %79 = arith.addf %76, %78 : vector<1x8x32xf32>
    %80 = vector.shape_cast %79 : vector<1x8x32xf32> to vector<8x32xf32>
    %81 = vector.extract_strided_slice %7 {offsets = [2, 0, 0], sizes = [1, 32, 16], strides = [1, 1, 1]} : vector<4x32x16xf32> to vector<1x32x16xf32>
    %82 = vector.shape_cast %81 : vector<1x32x16xf32> to vector<32x16xf32>
    %83 = vector.extract_strided_slice %10 {offsets = [2, 0, 0], sizes = [1, 1, 16], strides = [1, 1, 1]} : vector<4x1x16xf32> to vector<1x1x16xf32>
    %84 = vector.shape_cast %83 : vector<1x1x16xf32> to vector<1x16xf32>
    %cst_35 = arith.constant dense<0.000000e+00> : vector<8x16xf32>
    %85 = tpu.matmul %80, %82, %cst_35 {dimension_numbers = #tpu.dot_dimension_numbers<[1], [0], [0], [1], [0, 0, 1, 1], [], []>} : vector<8x32xf32>, vector<32x16xf32>, vector<8x16xf32> -> vector<8x16xf32>
    %86 = vector.broadcast %84 : vector<1x16xf32> to vector<8x16xf32>
    %87 = arith.addf %85, %86 : vector<8x16xf32>
    %88 = vector.shape_cast %87 : vector<8x16xf32> to vector<1x8x16xf32>
    %89 = vector.extract_strided_slice %7 {offsets = [3, 0, 0], sizes = [1, 32, 16], strides = [1, 1, 1]} : vector<4x32x16xf32> to vector<1x32x16xf32>
    %90 = vector.shape_cast %89 : vector<1x32x16xf32> to vector<32x16xf32>
    %91 = vector.extract_strided_slice %10 {offsets = [3, 0, 0], sizes = [1, 1, 16], strides = [1, 1, 1]} : vector<4x1x16xf32> to vector<1x1x16xf32>
    %92 = vector.shape_cast %91 : vector<1x1x16xf32> to vector<1x16xf32>
    %cst_36 = arith.constant dense<0.000000e+00> : vector<8x16xf32>
    %93 = tpu.matmul %2, %90, %cst_36 {dimension_numbers = #tpu.dot_dimension_numbers<[1], [0], [0], [1], [0, 0, 1, 1], [], []>} : vector<8x32xf32>, vector<32x16xf32>, vector<8x16xf32> -> vector<8x16xf32>
    %94 = vector.broadcast %92 : vector<1x16xf32> to vector<8x16xf32>
    %95 = arith.addf %93, %94 : vector<8x16xf32>
    %96 = vector.shape_cast %95 : vector<8x16xf32> to vector<1x8x16xf32>
    "tpu.trace_start"() <{level = 10 : i32, message = "bqd,bkd->bqk"}> : () -> ()
    %cst_37 = arith.constant dense<0.000000e+00> : vector<1x8x8xf32>
    %97 = tpu.matmul %88, %96, %cst_37 {dimension_numbers = #tpu.dot_dimension_numbers<[2], [2], [1], [1], [0, 0, 0, 1, 1, 1], [0], [0]>} : vector<1x8x16xf32>, vector<1x8x16xf32>, vector<1x8x8xf32> -> vector<1x8x8xf32>
    "tpu.trace_stop"() : () -> ()
    %98 = arith.addf %97, %4 : vector<1x8x8xf32>
    %cst_38 = arith.constant dense<0xFF800000> : vector<1x8xf32>
    %99 = vector.multi_reduction <maximumf>, %98, %cst_38 [2] : vector<1x8x8xf32> to vector<1x8xf32>
    %100 = vector.shape_cast %99 : vector<1x8xf32> to vector<1x8x1xf32>
    %101 = vector.broadcast %100 : vector<1x8x1xf32> to vector<1x8x8xf32>
    %102 = arith.subf %98, %101 : vector<1x8x8xf32>
    %103 = math.exp %102 : vector<1x8x8xf32>
    %cst_39 = arith.constant dense<0.000000e+00> : vector<1x8xf32>
    %104 = vector.multi_reduction <add>, %103, %cst_39 [2] : vector<1x8x8xf32> to vector<1x8xf32>
    %105 = vector.shape_cast %104 : vector<1x8xf32> to vector<1x8x1xf32>
    %106 = vector.broadcast %105 : vector<1x8x1xf32> to vector<1x8x8xf32>
    %107 = arith.divf %103, %106 : vector<1x8x8xf32>
    "tpu.trace_start"() <{level = 10 : i32, message = "bqk,bkd->bqd"}> : () -> ()
    %cst_40 = arith.constant dense<0.000000e+00> : vector<1x8x32xf32>
    %108 = tpu.matmul %107, %1, %cst_40 {dimension_numbers = #tpu.dot_dimension_numbers<[2], [1], [1], [2], [0, 0, 0, 1, 1, 2], [0], [0]>} : vector<1x8x8xf32>, vector<1x8x32xf32>, vector<1x8x32xf32> -> vector<1x8x32xf32>
    "tpu.trace_stop"() : () -> ()
    %109 = arith.addf %108, %79 : vector<1x8x32xf32>
    %110 = vector.extract_strided_slice %19 {offsets = [2, 0, 0], sizes = [1, 1, 32], strides = [1, 1, 1]} : vector<6x1x32xf32> to vector<1x1x32xf32>
    %111 = vector.shape_cast %110 : vector<1x1x32xf32> to vector<1x32xf32>
    %112 = vector.extract_strided_slice %19 {offsets = [3, 0, 0], sizes = [1, 1, 32], strides = [1, 1, 1]} : vector<6x1x32xf32> to vector<1x1x32xf32>
    %113 = vector.shape_cast %112 : vector<1x1x32xf32> to vector<1x32xf32>
    %cst_41 = arith.constant dense<0.000000e+00> : vector<1x8xf32>
    %114 = vector.multi_reduction <add>, %109, %cst_41 [2] : vector<1x8x32xf32> to vector<1x8xf32>
    %115 = vector.shape_cast %114 : vector<1x8xf32> to vector<1x8x1xf32>
    %cst_42 = arith.constant 3.200000e+01 : f32
    %116 = vector.broadcast %cst_42 : f32 to vector<1x8x1xf32>
    %117 = arith.divf %115, %116 : vector<1x8x1xf32>
    %118 = arith.mulf %109, %109 : vector<1x8x32xf32>
    %cst_43 = arith.constant dense<0.000000e+00> : vector<1x8xf32>
    %119 = vector.multi_reduction <add>, %118, %cst_43 [2] : vector<1x8x32xf32> to vector<1x8xf32>
    %120 = vector.shape_cast %119 : vector<1x8xf32> to vector<1x8x1xf32>
    %cst_44 = arith.constant 3.200000e+01 : f32
    %121 = vector.broadcast %cst_44 : f32 to vector<1x8x1xf32>
    %122 = arith.divf %120, %121 : vector<1x8x1xf32>
    %123 = arith.mulf %117, %117 : vector<1x8x1xf32>
    %124 = arith.subf %122, %123 : vector<1x8x1xf32>
    %cst_45 = arith.constant 0.000000e+00 : f32
    %125 = vector.broadcast %cst_45 : f32 to vector<1x8x1xf32>
    %126 = arith.maximumf %124, %125 : vector<1x8x1xf32>
    %127 = vector.broadcast %117 : vector<1x8x1xf32> to vector<1x8x32xf32>
    %128 = arith.subf %109, %127 : vector<1x8x32xf32>
    %cst_46 = arith.constant 9.99999974E-6 : f32
    %129 = vector.broadcast %cst_46 : f32 to vector<1x8x1xf32>
    %130 = arith.addf %126, %129 : vector<1x8x1xf32>
    %131 = math.rsqrt %130 : vector<1x8x1xf32>
    %132 = vector.broadcast %131 : vector<1x8x1xf32> to vector<1x8x32xf32>
    %133 = arith.mulf %128, %132 : vector<1x8x32xf32>
    %134 = vector.shape_cast %111 : vector<1x32xf32> to vector<1x1x32xf32>
    %135 = vector.broadcast %134 : vector<1x1x32xf32> to vector<1x8x32xf32>
    %136 = arith.mulf %133, %135 : vector<1x8x32xf32>
    %137 = vector.shape_cast %113 : vector<1x32xf32> to vector<1x1x32xf32>
    %138 = vector.broadcast %137 : vector<1x1x32xf32> to vector<1x8x32xf32>
    %139 = arith.addf %136, %138 : vector<1x8x32xf32>
    %140 = vector.shape_cast %139 : vector<1x8x32xf32> to vector<8x32xf32>
    %cst_47 = arith.constant dense<0.000000e+00> : vector<8x32xf32>
    %141 = tpu.matmul %140, %13, %cst_47 {dimension_numbers = #tpu.dot_dimension_numbers<[1], [0], [0], [1], [0, 0, 1, 1], [], []>} : vector<8x32xf32>, vector<32x32xf32>, vector<8x32xf32> -> vector<8x32xf32>
    %142 = vector.broadcast %16 : vector<1x32xf32> to vector<8x32xf32>
    %143 = arith.addf %141, %142 : vector<8x32xf32>
    %cst_48 = arith.constant 0.000000e+00 : f32
    %144 = vector.broadcast %cst_48 : f32 to vector<8x32xf32>
    %145 = arith.maximumf %143, %144 : vector<8x32xf32>
    %146 = vector.shape_cast %145 : vector<8x32xf32> to vector<1x8x32xf32>
    %147 = arith.addf %146, %139 : vector<1x8x32xf32>
    %148 = vector.extract_strided_slice %19 {offsets = [4, 0, 0], sizes = [1, 1, 32], strides = [1, 1, 1]} : vector<6x1x32xf32> to vector<1x1x32xf32>
    %149 = vector.shape_cast %148 : vector<1x1x32xf32> to vector<1x32xf32>
    %150 = vector.extract_strided_slice %19 {offsets = [5, 0, 0], sizes = [1, 1, 32], strides = [1, 1, 1]} : vector<6x1x32xf32> to vector<1x1x32xf32>
    %151 = vector.shape_cast %150 : vector<1x1x32xf32> to vector<1x32xf32>
    %cst_49 = arith.constant dense<0.000000e+00> : vector<1x8xf32>
    %152 = vector.multi_reduction <add>, %147, %cst_49 [2] : vector<1x8x32xf32> to vector<1x8xf32>
    %153 = vector.shape_cast %152 : vector<1x8xf32> to vector<1x8x1xf32>
    %cst_50 = arith.constant 3.200000e+01 : f32
    %154 = vector.broadcast %cst_50 : f32 to vector<1x8x1xf32>
    %155 = arith.divf %153, %154 : vector<1x8x1xf32>
    %156 = arith.mulf %147, %147 : vector<1x8x32xf32>
    %cst_51 = arith.constant dense<0.000000e+00> : vector<1x8xf32>
    %157 = vector.multi_reduction <add>, %156, %cst_51 [2] : vector<1x8x32xf32> to vector<1x8xf32>
    %158 = vector.shape_cast %157 : vector<1x8xf32> to vector<1x8x1xf32>
    %cst_52 = arith.constant 3.200000e+01 : f32
    %159 = vector.broadcast %cst_52 : f32 to vector<1x8x1xf32>
    %160 = arith.divf %158, %159 : vector<1x8x1xf32>
    %161 = arith.mulf %155, %155 : vector<1x8x1xf32>
    %162 = arith.subf %160, %161 : vector<1x8x1xf32>
    %cst_53 = arith.constant 0.000000e+00 : f32
    %163 = vector.broadcast %cst_53 : f32 to vector<1x8x1xf32>
    %164 = arith.maximumf %162, %163 : vector<1x8x1xf32>
    %165 = vector.broadcast %155 : vector<1x8x1xf32> to vector<1x8x32xf32>
    %166 = arith.subf %147, %165 : vector<1x8x32xf32>
    %cst_54 = arith.constant 9.99999974E-6 : f32
    %167 = vector.broadcast %cst_54 : f32 to vector<1x8x1xf32>
    %168 = arith.addf %164, %167 : vector<1x8x1xf32>
    %169 = math.rsqrt %168 : vector<1x8x1xf32>
    %170 = vector.broadcast %169 : vector<1x8x1xf32> to vector<1x8x32xf32>
    %171 = arith.mulf %166, %170 : vector<1x8x32xf32>
    %172 = vector.shape_cast %149 : vector<1x32xf32> to vector<1x1x32xf32>
    %173 = vector.broadcast %172 : vector<1x1x32xf32> to vector<1x8x32xf32>
    %174 = arith.mulf %171, %173 : vector<1x8x32xf32>
    %175 = vector.shape_cast %151 : vector<1x32xf32> to vector<1x1x32xf32>
    %176 = vector.broadcast %175 : vector<1x1x32xf32> to vector<1x8x32xf32>
    %177 = arith.addf %174, %176 : vector<1x8x32xf32>
    %c1_i32 = arith.constant 1 : i32
    %178 = arith.index_cast %c1_i32 : i32 to index
    %c0_55 = arith.constant 0 : index
    %c0_56 = arith.constant 0 : index
    %c0_57 = arith.constant 0 : index
    %179 = vector.load %arg5[%178, %c0_55, %c0_56, %c0_57] : memref<2x4x32x16xf32, #tpu.memory_space<vmem>>, vector<1x4x32x16xf32>
    %180 = vector.shape_cast %179 : vector<1x4x32x16xf32> to vector<4x32x16xf32>
    %181 = arith.index_cast %c1_i32 : i32 to index
    %c0_58 = arith.constant 0 : index
    %c0_59 = arith.constant 0 : index
    %c0_60 = arith.constant 0 : index
    %182 = vector.load %arg6[%181, %c0_58, %c0_59, %c0_60] : memref<2x4x1x16xf32, #tpu.memory_space<vmem>>, vector<1x4x1x16xf32>
    %183 = vector.shape_cast %182 : vector<1x4x1x16xf32> to vector<4x1x16xf32>
    %184 = arith.index_cast %c1_i32 : i32 to index
    %c0_61 = arith.constant 0 : index
    %c0_62 = arith.constant 0 : index
    %185 = vector.load %arg7[%184, %c0_61, %c0_62] : memref<2x32x32xf32, #tpu.memory_space<vmem>>, vector<1x32x32xf32>
    %186 = vector.shape_cast %185 : vector<1x32x32xf32> to vector<32x32xf32>
    %187 = arith.index_cast %c1_i32 : i32 to index
    %c0_63 = arith.constant 0 : index
    %c0_64 = arith.constant 0 : index
    %188 = vector.load %arg8[%187, %c0_63, %c0_64] : memref<2x1x32xf32, #tpu.memory_space<vmem>>, vector<1x1x32xf32>
    %189 = vector.shape_cast %188 : vector<1x1x32xf32> to vector<1x32xf32>
    %190 = arith.index_cast %c1_i32 : i32 to index
    %c0_65 = arith.constant 0 : index
    %c0_66 = arith.constant 0 : index
    %c0_67 = arith.constant 0 : index
    %191 = vector.load %arg9[%190, %c0_65, %c0_66, %c0_67] : memref<2x6x1x32xf32, #tpu.memory_space<vmem>>, vector<1x6x1x32xf32>
    %192 = vector.shape_cast %191 : vector<1x6x1x32xf32> to vector<6x1x32xf32>
    %193 = vector.shape_cast %177 : vector<1x8x32xf32> to vector<8x32xf32>
    %194 = vector.extract_strided_slice %180 {offsets = [0, 0, 0], sizes = [1, 32, 16], strides = [1, 1, 1]} : vector<4x32x16xf32> to vector<1x32x16xf32>
    %195 = vector.shape_cast %194 : vector<1x32x16xf32> to vector<32x16xf32>
    %196 = vector.extract_strided_slice %183 {offsets = [0, 0, 0], sizes = [1, 1, 16], strides = [1, 1, 1]} : vector<4x1x16xf32> to vector<1x1x16xf32>
    %197 = vector.shape_cast %196 : vector<1x1x16xf32> to vector<1x16xf32>
    %cst_68 = arith.constant dense<0.000000e+00> : vector<8x16xf32>
    %198 = tpu.matmul %193, %195, %cst_68 {dimension_numbers = #tpu.dot_dimension_numbers<[1], [0], [0], [1], [0, 0, 1, 1], [], []>} : vector<8x32xf32>, vector<32x16xf32>, vector<8x16xf32> -> vector<8x16xf32>
    %199 = vector.broadcast %197 : vector<1x16xf32> to vector<8x16xf32>
    %200 = arith.addf %198, %199 : vector<8x16xf32>
    %201 = vector.shape_cast %200 : vector<8x16xf32> to vector<1x8x16xf32>
    %202 = vector.extract_strided_slice %180 {offsets = [1, 0, 0], sizes = [1, 32, 16], strides = [1, 1, 1]} : vector<4x32x16xf32> to vector<1x32x16xf32>
    %203 = vector.shape_cast %202 : vector<1x32x16xf32> to vector<32x16xf32>
    %204 = vector.extract_strided_slice %183 {offsets = [1, 0, 0], sizes = [1, 1, 16], strides = [1, 1, 1]} : vector<4x1x16xf32> to vector<1x1x16xf32>
    %205 = vector.shape_cast %204 : vector<1x1x16xf32> to vector<1x16xf32>
    %cst_69 = arith.constant dense<0.000000e+00> : vector<8x16xf32>
    %206 = tpu.matmul %193, %203, %cst_69 {dimension_numbers = #tpu.dot_dimension_numbers<[1], [0], [0], [1], [0, 0, 1, 1], [], []>} : vector<8x32xf32>, vector<32x16xf32>, vector<8x16xf32> -> vector<8x16xf32>
    %207 = vector.broadcast %205 : vector<1x16xf32> to vector<8x16xf32>
    %208 = arith.addf %206, %207 : vector<8x16xf32>
    %209 = vector.shape_cast %208 : vector<8x16xf32> to vector<1x8x16xf32>
    "tpu.trace_start"() <{level = 10 : i32, message = "bqd,bkd->bqk"}> : () -> ()
    %cst_70 = arith.constant dense<0.000000e+00> : vector<1x8x8xf32>
    %210 = tpu.matmul %201, %209, %cst_70 {dimension_numbers = #tpu.dot_dimension_numbers<[2], [2], [1], [1], [0, 0, 0, 1, 1, 1], [0], [0]>} : vector<1x8x16xf32>, vector<1x8x16xf32>, vector<1x8x8xf32> -> vector<1x8x8xf32>
    "tpu.trace_stop"() : () -> ()
    %211 = arith.addf %210, %3 : vector<1x8x8xf32>
    %cst_71 = arith.constant dense<0xFF800000> : vector<1x8xf32>
    %212 = vector.multi_reduction <maximumf>, %211, %cst_71 [2] : vector<1x8x8xf32> to vector<1x8xf32>
    %213 = vector.shape_cast %212 : vector<1x8xf32> to vector<1x8x1xf32>
    %214 = vector.broadcast %213 : vector<1x8x1xf32> to vector<1x8x8xf32>
    %215 = arith.subf %211, %214 : vector<1x8x8xf32>
    %216 = math.exp %215 : vector<1x8x8xf32>
    %cst_72 = arith.constant dense<0.000000e+00> : vector<1x8xf32>
    %217 = vector.multi_reduction <add>, %216, %cst_72 [2] : vector<1x8x8xf32> to vector<1x8xf32>
    %218 = vector.shape_cast %217 : vector<1x8xf32> to vector<1x8x1xf32>
    %219 = vector.broadcast %218 : vector<1x8x1xf32> to vector<1x8x8xf32>
    %220 = arith.divf %216, %219 : vector<1x8x8xf32>
    "tpu.trace_start"() <{level = 10 : i32, message = "bqk,bkd->bqd"}> : () -> ()
    %cst_73 = arith.constant dense<0.000000e+00> : vector<1x8x32xf32>
    %221 = tpu.matmul %220, %177, %cst_73 {dimension_numbers = #tpu.dot_dimension_numbers<[2], [1], [1], [2], [0, 0, 0, 1, 1, 2], [0], [0]>} : vector<1x8x8xf32>, vector<1x8x32xf32>, vector<1x8x32xf32> -> vector<1x8x32xf32>
    "tpu.trace_stop"() : () -> ()
    %222 = arith.addf %221, %177 : vector<1x8x32xf32>
    %223 = vector.extract_strided_slice %192 {offsets = [0, 0, 0], sizes = [1, 1, 32], strides = [1, 1, 1]} : vector<6x1x32xf32> to vector<1x1x32xf32>
    %224 = vector.shape_cast %223 : vector<1x1x32xf32> to vector<1x32xf32>
    %225 = vector.extract_strided_slice %192 {offsets = [1, 0, 0], sizes = [1, 1, 32], strides = [1, 1, 1]} : vector<6x1x32xf32> to vector<1x1x32xf32>
    %226 = vector.shape_cast %225 : vector<1x1x32xf32> to vector<1x32xf32>
    %cst_74 = arith.constant dense<0.000000e+00> : vector<1x8xf32>
    %227 = vector.multi_reduction <add>, %222, %cst_74 [2] : vector<1x8x32xf32> to vector<1x8xf32>
    %228 = vector.shape_cast %227 : vector<1x8xf32> to vector<1x8x1xf32>
    %cst_75 = arith.constant 3.200000e+01 : f32
    %229 = vector.broadcast %cst_75 : f32 to vector<1x8x1xf32>
    %230 = arith.divf %228, %229 : vector<1x8x1xf32>
    %231 = arith.mulf %222, %222 : vector<1x8x32xf32>
    %cst_76 = arith.constant dense<0.000000e+00> : vector<1x8xf32>
    %232 = vector.multi_reduction <add>, %231, %cst_76 [2] : vector<1x8x32xf32> to vector<1x8xf32>
    %233 = vector.shape_cast %232 : vector<1x8xf32> to vector<1x8x1xf32>
    %cst_77 = arith.constant 3.200000e+01 : f32
    %234 = vector.broadcast %cst_77 : f32 to vector<1x8x1xf32>
    %235 = arith.divf %233, %234 : vector<1x8x1xf32>
    %236 = arith.mulf %230, %230 : vector<1x8x1xf32>
    %237 = arith.subf %235, %236 : vector<1x8x1xf32>
    %cst_78 = arith.constant 0.000000e+00 : f32
    %238 = vector.broadcast %cst_78 : f32 to vector<1x8x1xf32>
    %239 = arith.maximumf %237, %238 : vector<1x8x1xf32>
    %240 = vector.broadcast %230 : vector<1x8x1xf32> to vector<1x8x32xf32>
    %241 = arith.subf %222, %240 : vector<1x8x32xf32>
    %cst_79 = arith.constant 9.99999974E-6 : f32
    %242 = vector.broadcast %cst_79 : f32 to vector<1x8x1xf32>
    %243 = arith.addf %239, %242 : vector<1x8x1xf32>
    %244 = math.rsqrt %243 : vector<1x8x1xf32>
    %245 = vector.broadcast %244 : vector<1x8x1xf32> to vector<1x8x32xf32>
    %246 = arith.mulf %241, %245 : vector<1x8x32xf32>
    %247 = vector.shape_cast %224 : vector<1x32xf32> to vector<1x1x32xf32>
    %248 = vector.broadcast %247 : vector<1x1x32xf32> to vector<1x8x32xf32>
    %249 = arith.mulf %246, %248 : vector<1x8x32xf32>
    %250 = vector.shape_cast %226 : vector<1x32xf32> to vector<1x1x32xf32>
    %251 = vector.broadcast %250 : vector<1x1x32xf32> to vector<1x8x32xf32>
    %252 = arith.addf %249, %251 : vector<1x8x32xf32>
    %253 = vector.shape_cast %252 : vector<1x8x32xf32> to vector<8x32xf32>
    %254 = vector.extract_strided_slice %180 {offsets = [2, 0, 0], sizes = [1, 32, 16], strides = [1, 1, 1]} : vector<4x32x16xf32> to vector<1x32x16xf32>
    %255 = vector.shape_cast %254 : vector<1x32x16xf32> to vector<32x16xf32>
    %256 = vector.extract_strided_slice %183 {offsets = [2, 0, 0], sizes = [1, 1, 16], strides = [1, 1, 1]} : vector<4x1x16xf32> to vector<1x1x16xf32>
    %257 = vector.shape_cast %256 : vector<1x1x16xf32> to vector<1x16xf32>
    %cst_80 = arith.constant dense<0.000000e+00> : vector<8x16xf32>
    %258 = tpu.matmul %253, %255, %cst_80 {dimension_numbers = #tpu.dot_dimension_numbers<[1], [0], [0], [1], [0, 0, 1, 1], [], []>} : vector<8x32xf32>, vector<32x16xf32>, vector<8x16xf32> -> vector<8x16xf32>
    %259 = vector.broadcast %257 : vector<1x16xf32> to vector<8x16xf32>
    %260 = arith.addf %258, %259 : vector<8x16xf32>
    %261 = vector.shape_cast %260 : vector<8x16xf32> to vector<1x8x16xf32>
    %262 = vector.extract_strided_slice %180 {offsets = [3, 0, 0], sizes = [1, 32, 16], strides = [1, 1, 1]} : vector<4x32x16xf32> to vector<1x32x16xf32>
    %263 = vector.shape_cast %262 : vector<1x32x16xf32> to vector<32x16xf32>
    %264 = vector.extract_strided_slice %183 {offsets = [3, 0, 0], sizes = [1, 1, 16], strides = [1, 1, 1]} : vector<4x1x16xf32> to vector<1x1x16xf32>
    %265 = vector.shape_cast %264 : vector<1x1x16xf32> to vector<1x16xf32>
    %cst_81 = arith.constant dense<0.000000e+00> : vector<8x16xf32>
    %266 = tpu.matmul %2, %263, %cst_81 {dimension_numbers = #tpu.dot_dimension_numbers<[1], [0], [0], [1], [0, 0, 1, 1], [], []>} : vector<8x32xf32>, vector<32x16xf32>, vector<8x16xf32> -> vector<8x16xf32>
    %267 = vector.broadcast %265 : vector<1x16xf32> to vector<8x16xf32>
    %268 = arith.addf %266, %267 : vector<8x16xf32>
    %269 = vector.shape_cast %268 : vector<8x16xf32> to vector<1x8x16xf32>
    "tpu.trace_start"() <{level = 10 : i32, message = "bqd,bkd->bqk"}> : () -> ()
    %cst_82 = arith.constant dense<0.000000e+00> : vector<1x8x8xf32>
    %270 = tpu.matmul %261, %269, %cst_82 {dimension_numbers = #tpu.dot_dimension_numbers<[2], [2], [1], [1], [0, 0, 0, 1, 1, 1], [0], [0]>} : vector<1x8x16xf32>, vector<1x8x16xf32>, vector<1x8x8xf32> -> vector<1x8x8xf32>
    "tpu.trace_stop"() : () -> ()
    %271 = arith.addf %270, %4 : vector<1x8x8xf32>
    %cst_83 = arith.constant dense<0xFF800000> : vector<1x8xf32>
    %272 = vector.multi_reduction <maximumf>, %271, %cst_83 [2] : vector<1x8x8xf32> to vector<1x8xf32>
    %273 = vector.shape_cast %272 : vector<1x8xf32> to vector<1x8x1xf32>
    %274 = vector.broadcast %273 : vector<1x8x1xf32> to vector<1x8x8xf32>
    %275 = arith.subf %271, %274 : vector<1x8x8xf32>
    %276 = math.exp %275 : vector<1x8x8xf32>
    %cst_84 = arith.constant dense<0.000000e+00> : vector<1x8xf32>
    %277 = vector.multi_reduction <add>, %276, %cst_84 [2] : vector<1x8x8xf32> to vector<1x8xf32>
    %278 = vector.shape_cast %277 : vector<1x8xf32> to vector<1x8x1xf32>
    %279 = vector.broadcast %278 : vector<1x8x1xf32> to vector<1x8x8xf32>
    %280 = arith.divf %276, %279 : vector<1x8x8xf32>
    "tpu.trace_start"() <{level = 10 : i32, message = "bqk,bkd->bqd"}> : () -> ()
    %cst_85 = arith.constant dense<0.000000e+00> : vector<1x8x32xf32>
    %281 = tpu.matmul %280, %1, %cst_85 {dimension_numbers = #tpu.dot_dimension_numbers<[2], [1], [1], [2], [0, 0, 0, 1, 1, 2], [0], [0]>} : vector<1x8x8xf32>, vector<1x8x32xf32>, vector<1x8x32xf32> -> vector<1x8x32xf32>
    "tpu.trace_stop"() : () -> ()
    %282 = arith.addf %281, %252 : vector<1x8x32xf32>
    %283 = vector.extract_strided_slice %192 {offsets = [2, 0, 0], sizes = [1, 1, 32], strides = [1, 1, 1]} : vector<6x1x32xf32> to vector<1x1x32xf32>
    %284 = vector.shape_cast %283 : vector<1x1x32xf32> to vector<1x32xf32>
    %285 = vector.extract_strided_slice %192 {offsets = [3, 0, 0], sizes = [1, 1, 32], strides = [1, 1, 1]} : vector<6x1x32xf32> to vector<1x1x32xf32>
    %286 = vector.shape_cast %285 : vector<1x1x32xf32> to vector<1x32xf32>
    %cst_86 = arith.constant dense<0.000000e+00> : vector<1x8xf32>
    %287 = vector.multi_reduction <add>, %282, %cst_86 [2] : vector<1x8x32xf32> to vector<1x8xf32>
    %288 = vector.shape_cast %287 : vector<1x8xf32> to vector<1x8x1xf32>
    %cst_87 = arith.constant 3.200000e+01 : f32
    %289 = vector.broadcast %cst_87 : f32 to vector<1x8x1xf32>
    %290 = arith.divf %288, %289 : vector<1x8x1xf32>
    %291 = arith.mulf %282, %282 : vector<1x8x32xf32>
    %cst_88 = arith.constant dense<0.000000e+00> : vector<1x8xf32>
    %292 = vector.multi_reduction <add>, %291, %cst_88 [2] : vector<1x8x32xf32> to vector<1x8xf32>
    %293 = vector.shape_cast %292 : vector<1x8xf32> to vector<1x8x1xf32>
    %cst_89 = arith.constant 3.200000e+01 : f32
    %294 = vector.broadcast %cst_89 : f32 to vector<1x8x1xf32>
    %295 = arith.divf %293, %294 : vector<1x8x1xf32>
    %296 = arith.mulf %290, %290 : vector<1x8x1xf32>
    %297 = arith.subf %295, %296 : vector<1x8x1xf32>
    %cst_90 = arith.constant 0.000000e+00 : f32
    %298 = vector.broadcast %cst_90 : f32 to vector<1x8x1xf32>
    %299 = arith.maximumf %297, %298 : vector<1x8x1xf32>
    %300 = vector.broadcast %290 : vector<1x8x1xf32> to vector<1x8x32xf32>
    %301 = arith.subf %282, %300 : vector<1x8x32xf32>
    %cst_91 = arith.constant 9.99999974E-6 : f32
    %302 = vector.broadcast %cst_91 : f32 to vector<1x8x1xf32>
    %303 = arith.addf %299, %302 : vector<1x8x1xf32>
    %304 = math.rsqrt %303 : vector<1x8x1xf32>
    %305 = vector.broadcast %304 : vector<1x8x1xf32> to vector<1x8x32xf32>
    %306 = arith.mulf %301, %305 : vector<1x8x32xf32>
    %307 = vector.shape_cast %284 : vector<1x32xf32> to vector<1x1x32xf32>
    %308 = vector.broadcast %307 : vector<1x1x32xf32> to vector<1x8x32xf32>
    %309 = arith.mulf %306, %308 : vector<1x8x32xf32>
    %310 = vector.shape_cast %286 : vector<1x32xf32> to vector<1x1x32xf32>
    %311 = vector.broadcast %310 : vector<1x1x32xf32> to vector<1x8x32xf32>
    %312 = arith.addf %309, %311 : vector<1x8x32xf32>
    %313 = vector.shape_cast %312 : vector<1x8x32xf32> to vector<8x32xf32>
    %cst_92 = arith.constant dense<0.000000e+00> : vector<8x32xf32>
    %314 = tpu.matmul %313, %186, %cst_92 {dimension_numbers = #tpu.dot_dimension_numbers<[1], [0], [0], [1], [0, 0, 1, 1], [], []>} : vector<8x32xf32>, vector<32x32xf32>, vector<8x32xf32> -> vector<8x32xf32>
    %315 = vector.broadcast %189 : vector<1x32xf32> to vector<8x32xf32>
    %316 = arith.addf %314, %315 : vector<8x32xf32>
    %cst_93 = arith.constant 0.000000e+00 : f32
    %317 = vector.broadcast %cst_93 : f32 to vector<8x32xf32>
    %318 = arith.maximumf %316, %317 : vector<8x32xf32>
    %319 = vector.shape_cast %318 : vector<8x32xf32> to vector<1x8x32xf32>
    %320 = arith.addf %319, %312 : vector<1x8x32xf32>
    %321 = vector.extract_strided_slice %192 {offsets = [4, 0, 0], sizes = [1, 1, 32], strides = [1, 1, 1]} : vector<6x1x32xf32> to vector<1x1x32xf32>
    %322 = vector.shape_cast %321 : vector<1x1x32xf32> to vector<1x32xf32>
    %323 = vector.extract_strided_slice %192 {offsets = [5, 0, 0], sizes = [1, 1, 32], strides = [1, 1, 1]} : vector<6x1x32xf32> to vector<1x1x32xf32>
    %324 = vector.shape_cast %323 : vector<1x1x32xf32> to vector<1x32xf32>
    %cst_94 = arith.constant dense<0.000000e+00> : vector<1x8xf32>
    %325 = vector.multi_reduction <add>, %320, %cst_94 [2] : vector<1x8x32xf32> to vector<1x8xf32>
    %326 = vector.shape_cast %325 : vector<1x8xf32> to vector<1x8x1xf32>
    %cst_95 = arith.constant 3.200000e+01 : f32
    %327 = vector.broadcast %cst_95 : f32 to vector<1x8x1xf32>
    %328 = arith.divf %326, %327 : vector<1x8x1xf32>
    %329 = arith.mulf %320, %320 : vector<1x8x32xf32>
    %cst_96 = arith.constant dense<0.000000e+00> : vector<1x8xf32>
    %330 = vector.multi_reduction <add>, %329, %cst_96 [2] : vector<1x8x32xf32> to vector<1x8xf32>
    %331 = vector.shape_cast %330 : vector<1x8xf32> to vector<1x8x1xf32>
    %cst_97 = arith.constant 3.200000e+01 : f32
    %332 = vector.broadcast %cst_97 : f32 to vector<1x8x1xf32>
    %333 = arith.divf %331, %332 : vector<1x8x1xf32>
    %334 = arith.mulf %328, %328 : vector<1x8x1xf32>
    %335 = arith.subf %333, %334 : vector<1x8x1xf32>
    %cst_98 = arith.constant 0.000000e+00 : f32
    %336 = vector.broadcast %cst_98 : f32 to vector<1x8x1xf32>
    %337 = arith.maximumf %335, %336 : vector<1x8x1xf32>
    %338 = vector.broadcast %328 : vector<1x8x1xf32> to vector<1x8x32xf32>
    %339 = arith.subf %320, %338 : vector<1x8x32xf32>
    %cst_99 = arith.constant 9.99999974E-6 : f32
    %340 = vector.broadcast %cst_99 : f32 to vector<1x8x1xf32>
    %341 = arith.addf %337, %340 : vector<1x8x1xf32>
    %342 = math.rsqrt %341 : vector<1x8x1xf32>
    %343 = vector.broadcast %342 : vector<1x8x1xf32> to vector<1x8x32xf32>
    %344 = arith.mulf %339, %343 : vector<1x8x32xf32>
    %345 = vector.shape_cast %322 : vector<1x32xf32> to vector<1x1x32xf32>
    %346 = vector.broadcast %345 : vector<1x1x32xf32> to vector<1x8x32xf32>
    %347 = arith.mulf %344, %346 : vector<1x8x32xf32>
    %348 = vector.shape_cast %324 : vector<1x32xf32> to vector<1x1x32xf32>
    %349 = vector.broadcast %348 : vector<1x1x32xf32> to vector<1x8x32xf32>
    %350 = arith.addf %347, %349 : vector<1x8x32xf32>
    %c2_i32 = arith.constant 2 : i32
    %c0_100 = arith.constant 0 : index
    %c0_101 = arith.constant 0 : index
    %c0_102 = arith.constant 0 : index
    %351 = vector.load %arg10[%c0_100, %c0_101, %c0_102] : memref<1x8x32xf32, #tpu.memory_space<vmem>>, vector<1x8x32xf32>
    tpu.vector_store %arg10[%c0_100, %c0_101, %c0_102], %350 {strides = array<i32>} : memref<1x8x32xf32, #tpu.memory_space<vmem>>, vector<1x8x32xf32>,
    return
  }
  func.func @transform_0(%arg0: i32) -> (i32, i32, i32) {
    %c0_i32 = arith.constant 0 : i32
    %c0_i32_0 = arith.constant 0 : i32
    %c0_i32_1 = arith.constant 0 : i32
    return %arg0, %c0_i32, %c0_i32_0 : i32, i32, i32
  }
  func.func @transform_1(%arg0: i32) -> (i32, i32, i32) {
    %c0_i32 = arith.constant 0 : i32
    %c0_i32_0 = arith.constant 0 : i32
    %c0_i32_1 = arith.constant 0 : i32
    return %arg0, %c0_i32, %c0_i32_0 : i32, i32, i32
  }
  func.func @transform_2(%arg0: i32) -> (i32, i32, i32) {
    %c0_i32 = arith.constant 0 : i32
    %c0_i32_0 = arith.constant 0 : i32
    %c0_i32_1 = arith.constant 0 : i32
    return %arg0, %c0_i32, %c0_i32_0 : i32, i32, i32
  }
  func.func @transform_3(%arg0: i32) -> (i32, i32, i32) {
    %c0_i32 = arith.constant 0 : i32
    %c0_i32_0 = arith.constant 0 : i32
    %c0_i32_1 = arith.constant 0 : i32
    return %arg0, %c0_i32, %c0_i32_0 : i32, i32, i32
  }
  func.func @transform_4(%arg0: i32) -> (i32, i32, i32, i32) {
    %c0_i32 = arith.constant 0 : i32
    %c0_i32_0 = arith.constant 0 : i32
    %c0_i32_1 = arith.constant 0 : i32
    %c0_i32_2 = arith.constant 0 : i32
    %c0_i32_3 = arith.constant 0 : i32
    return %c0_i32, %c0_i32_0, %c0_i32_1, %c0_i32_2 : i32, i32, i32, i32
  }
  func.func @transform_5(%arg0: i32) -> (i32, i32, i32, i32) {
    %c0_i32 = arith.constant 0 : i32
    %c0_i32_0 = arith.constant 0 : i32
    %c0_i32_1 = arith.constant 0 : i32
    %c0_i32_2 = arith.constant 0 : i32
    %c0_i32_3 = arith.constant 0 : i32
    return %c0_i32, %c0_i32_0, %c0_i32_1, %c0_i32_2 : i32, i32, i32, i32
  }
  func.func @transform_6(%arg0: i32) -> (i32, i32, i32) {
    %c0_i32 = arith.constant 0 : i32
    %c0_i32_0 = arith.constant 0 : i32
    %c0_i32_1 = arith.constant 0 : i32
    %c0_i32_2 = arith.constant 0 : i32
    return %c0_i32, %c0_i32_0, %c0_i32_1 : i32, i32, i32
  }
  func.func @transform_7(%arg0: i32) -> (i32, i32, i32) {
    %c0_i32 = arith.constant 0 : i32
    %c0_i32_0 = arith.constant 0 : i32
    %c0_i32_1 = arith.constant 0 : i32
    %c0_i32_2 = arith.constant 0 : i32
    return %c0_i32, %c0_i32_0, %c0_i32_1 : i32, i32, i32
  }
  func.func @transform_8(%arg0: i32) -> (i32, i32, i32, i32) {
    %c0_i32 = arith.constant 0 : i32
    %c0_i32_0 = arith.constant 0 : i32
    %c0_i32_1 = arith.constant 0 : i32
    %c0_i32_2 = arith.constant 0 : i32
    %c0_i32_3 = arith.constant 0 : i32
    return %c0_i32, %c0_i32_0, %c0_i32_1, %c0_i32_2 : i32, i32, i32, i32
  }
  func.func @transform_9(%arg0: i32) -> (i32, i32, i32) {
    %c0_i32 = arith.constant 0 : i32
    %c0_i32_0 = arith.constant 0 : i32
    %c0_i32_1 = arith.constant 0 : i32
    return %arg0, %c0_i32, %c0_i32_0 : i32, i32, i32
  }
}

</mosaic_0001>

<bundles_post_ra>
// kernel: decoder_forward.1
= control target key start
LH: loop header
LB: loop body
LE: loop exit
PB: predicated region body
PF: predicated region fallthrough
CT: control target
= control target key end

     0   :  { %14 = vsyncpa [#allocation3], 0  ;;  %s1947_s0 = inlined_call_operand.vmem [shape: f32[2,8,32], index: 0, kind: input, shape index: {}]   ;;  %s1948_s1 = inlined_call_operand.vmem [shape: f32[2,8,32], index: 1, kind: input, shape index: {}]   ;;  %s1949_s2 = inlined_call_operand.vmem [shape: f32[2,8,8], index: 2, kind: input, shape index: {}]   ;;  %s1950_s3 = inlined_call_operand.vmem [shape: f32[2,8,8], index: 3, kind: input, shape index: {}]   ;;  %s1951_s4 = inlined_call_operand.vmem [shape: f32[2,4,32,16], index: 4, kind: input, shape index: {}]   ;;  %s1952_s5 = inlined_call_operand.vmem [shape: f32[2,4,1,16], index: 5, kind: input, shape index: {}]   ;;  %s1953_s6 = inlined_call_operand.vmem [shape: f32[2,32,32], index: 6, kind: input, shape index: {}]   ;;  %s1954_s7 = inlined_call_operand.vmem [shape: f32[2,1,32], index: 7, kind: input, shape index: {}]   ;;  %s1955_s8 = inlined_call_operand.vmem [shape: f32[2,6,1,32], index: 8, kind: input, shape index: {}]   ;;  %s1956_s9 = inlined_call_operand.hbm [shape: f32[2,8,32], index: 9, kind: output, shape index: {}]  }
   0x1   :  { %16 = vsyncpa [#allocation3 + $0x1], 0  ;;  %s1590_s30 = smov 0   ;;  %s1592_s10 = smov 0  }
   0x2   :  { %s1594_s11 = smov 0   ;;  %s1596_s12 = smov 0  }
   0x3 LB: > { %s1611_s13 = sadd.s32 4294967295, %s1537_s12   ;;  %s1317_s14 = sadd.s32 4294967294, %s1537_s12   ;;  %s1537_s12 = sphi %s1596_s12, %s1962_s12   ;;  %s1533_s11 = sphi %s1594_s11, %s1961_s11   ;;  %s1529_s10 = sphi %s1592_s10, %s1960_s10   ;;  %s1525_s30 = sphi %s1590_s30, %s1959_s30  }
   0x4   : > { %s1615_s15 = sadd.s32 1, %s1537_s12   ;;  %s238_s16 = sadd.s32 1, %s1533_s11 }
   0x5   : > { %s235_s17 = ssub.s32 %s1537_s12, %s1615_s15  ;;  %p248_p0 = scmp.ne.s32.totalorder %s1533_s11, %s1529_s10 }
   0x6   : > { %p236_p1 = scmp.eq.s32.totalorder %s235_s17, 0  ;;  %p249_p2 = scmp.eq.s32.totalorder %s1611_s13, 1 }
   0x7   : > { %p254_p3 = scmp.ne.s32.totalorder %s1529_s10, %s1525_s30  ;;  %p255_p4 = scmp.eq.s32.totalorder %s1317_s14, 1 }
   0x8   : > { %s1626_s18 = scalar_select %p236_p1, %s1533_s11, %s238_s16  }
   0x9   : > { %p1628_p5 = por %p249_p2, %p248_p0  ;;  %p1632_p6 = por %p255_p4, %p254_p3 }
   0xa   : > { %p1320_p7 = scmp.ge.s32.totalorder %s1537_s12, 1  ;;  %p316_p8 = scmp.lt.s32.totalorder %s1537_s12, 3 }
   0xc   : > { %p317_p9 = pnand %p1320_p7, %p316_p8 }
   0xd   : > { %p363_p10 = scmp.lt.s32.totalorder (!%p317_p9), %s1611_s13, 1  ;;  %s360_s26 = sand.u32 (!%p317_p9), 1, %s1529_s10  }
   0xe   : > { %320 = sbr.rel (%p317_p9) target bundleno = 3855 (0xf0f), region = 56  ;;  %s1321_s27 = sshll.u32 (!%p317_p9), %s360_s26, 3 }
   0xf   : > { %s1380_s28 = sshll.u32 (!%p317_p9), %s1611_s13, 3 }
  0x13   : > { %v390_v0 = vld [vmem:[%s1951_s4 + $0x38] sm:$0xff]  ;;  %v389_v1 = vld [vmem:[%s1951_s4 + $0x30] sm:$0xff]  ;;  %v388_v4 = vld [vmem:[%s1951_s4 + $0x28] sm:$0xff]  ;;  %s364_s21 = scalar_select %p363_p10, %s1611_s13, 1  ;;  %vm417_vm0 = vcmask 261120   ;;  %vm464_vm1 = vcmask 130048  }
  0x14   : > { %v386_v2 = vld [vmem:[%s1951_s4 + $0x18] sm:$0xff]  ;;  %456 = vmatpush.msra.mxu1 %v390_v0  ;;  %v385_v3 = vld [vmem:[%s1951_s4 + $0x10] sm:$0xff]  ;;  %v384_v5 = vld [vmem:[%s1951_s4 + $0x8] sm:$0xff]  ;;  %vm491_vm2 = vcmask 64512   ;;  %v1539_v41 = vmov 32.0   ;;  %s362_s13 = scalar_lea.vmem [#allocation2], %s1321_s27 }
  0x15   : > { %433 = vmatpush.msra.mxu0 %v386_v2  ;;  %v387_v6 = vld [vmem:[%s1951_s4 + $0x20] sm:$0xff]  ;;  %s1661_s24 = sshll.u32 %s364_s21, 3  ;;  %v398_v47 = vld [vmem:[%s1951_s4 + $0x78] sm:$0xff]  ;;  %v397_v49 = vld [vmem:[%s1951_s4 + $0x70] sm:$0xff]  ;;  %s1219_s23 = sshll.u32 %s362_s13, 4  ;;  %s1220_s23 = int_to_ptr.vmem [resolvable:$true] %s1219_s23 }
  0x16   : > { %457 = vmatpush.msra.mxu1 %v389_v1  ;;  %v383_v7 = vld [vmem:[%s1951_s4] sm:$0xff]  ;;  %s366_s29 = scalar_lea.vmem %s1947_s0, %s1661_s24  ;;  %s374_s25 = scalar_lea.vmem %s1949_s2, %s1661_s24  ;;  %v394_v50 = vld [vmem:[%s1951_s4 + $0x58] sm:$0xff]  ;;  %v396_v52 = vld [vmem:[%s1951_s4 + $0x68] sm:$0xff] }
  0x17   : > { %434 = vmatpush.msra.mxu0 %v385_v3  ;;  %v379_v8 = vld [vmem:[%s366_s29] sm:$0xff]  ;;  %s370_s14 = scalar_lea.vmem %s1948_s1, %s1661_s24  ;;  %v393_v55 = vld [vmem:[%s1951_s4 + $0x50] sm:$0xff]  ;;  %v392_v56 = vld [vmem:[%s1951_s4 + $0x48] sm:$0xff]  ;;  %s378_s22 = scalar_lea.vmem %s1950_s3, %s1661_s24 }
  0x18   : > { %458 = vmatpush.msra.mxu1 %v388_v4  ;;  %534 = vmatpush.msra.mxu3 %v379_v8  ;;  %v1423_v9 = vld [vmem:[%s1952_s5 + $0x1] ss:$0 sm:$0xff]  ;;  %v1424_v10 = vld [vmem:[%s1952_s5] ss:$0 sm:$0xff]  ;;  %s1207_s29 = scalar_lea.sflag [#allocation3], %s360_s26  ;;  %s1495_s27 = scalar_lea.hbm %s1956_s9, 16 }
  0x19   : > { %435 = vmatpush.msra.mxu0 %v384_v5  ;;  %v1684_v15 = vld [vmem:[%s374_s25] sm:$0xff] }
  0x1a   : > { %459 = vmatpush.msra.mxu1 %v387_v6  ;;  %597 = vmatpush.msrb.mxu3 %v394_v50  ;;  %v395_v53 = vld [vmem:[%s1951_s4 + $0x60] sm:$0xff] }
  0x1b   : > { %436 = vmatpush.msra.mxu0 %v383_v7  ;;  %1327 = vmatmul.msk.f32.vlgmr.msra.gmra.mxu1 %vm417_vm0, %v379_v8  ;;  %v1713_v54 = vld [vmem:[%s370_s14] sm:$0xff] }
  0x1c   : > { %1326 = vmatmul.msk.f32.vlgmr.msra.gmra.mxu0 %vm417_vm0, %v379_v8  ;;  %699 = vmatpush.msrb.mxu1 %v1713_v54  ;;  %v391_v58 = vld [vmem:[%s1951_s4 + $0x40] sm:$0xff] }
  0x1d   : > { %598 = vmatpush.msrb.mxu3 %v393_v55  ;;  %v403_v50 = vld [vmem:[%s1953_s6] sm:$0xff] }
  0x1f   : > { %599 = vmatpush.msrb.mxu3 %v392_v56 }
  0x21   : > { %600 = vmatpush.msrb.mxu3 %v391_v58 }
  0x98   : > { %v461_v11 = vpop.f32.mrf.mxu1 }
  0x99   : > { %v438_v12 = vpop.f32.mrf.mxu0  ;;  %v462_v13 = vadd.f32 %v1423_v9, %v461_v11  ;;  %v1426_v11 = vld [vmem:[%s1955_s8 + $0x1] ss:$0 sm:$0xff] }
  0x9a   : > { %v439_v14 = vadd.f32 %v1424_v10, %v438_v12 }
  0x9b   : > { %1328 = vmatpush.xpose.msk.msra.mxu2 %vm464_vm1, %v462_v13 }
  0x9e   : > { %1329 = vmatmul.msk.f32.vlgmr.msra.gmra.mxu2 %vm464_vm1, %v439_v14  ;;  %v1427_v14 = vld [vmem:[%s1952_s5 + $0x3] ss:$0 sm:$0xff] }
  0x9f   : > { %623 = vmatpush.msrb.mxu2 %v398_v47  ;;  %v406_v47 = vld [vmem:[%s1953_s6 + $0x18] sm:$0xff] }
  0xa1   : > { %624 = vmatpush.msrb.mxu2 %v397_v49  ;;  %v404_v49 = vld [vmem:[%s1953_s6 + $0x8] sm:$0xff] }
  0xa3   : > { %625 = vmatpush.msrb.mxu2 %v396_v52 }
  0xa5   : > { %626 = vmatpush.msrb.mxu2 %v395_v53 }
  0xa6   : > { %1332 = vmatmul.msk.f32.vlgmr.msrb.gmra.mxu2 %vm417_vm0, %v1713_v54 }
 0x121   : > { %v488_v16 = vpop.f32.mrf.mxu2 }
 0x122   : > { %v489_v17 = vadd.f32 %v488_v16, %v1684_v15 }
 0x124   : > { %v492_v18 = vsel %vm491_vm2, %v489_v17, -inf }
 0x125   : > { %493 = vmax.xlane.f32.xlu0 %v492_v18  ;;  %v1428_v18 = vld [vmem:[%s1952_s5 + $0x2] ss:$0 sm:$0xff] }
 0x129   : > { %v628_v16 = vpop.f32.mrf.mxu2 }
 0x198   : > { %v494_v19 = vpop.xlane.xlu0 %493 }
 0x199   : > { %v495_v20 = vsub.f32 %v489_v17, %v494_v19  ;;  %v629_v17 = vadd.f32 %v1427_v14, %v628_v16 }
 0x19b   : > { %v496_v21 = vmul.f32 1.442695, %v495_v20  ;;  %1333 = vmatpush.xpose.msk.msrb.mxu0 %vm464_vm1, %v629_v17 }
 0x19d   : > { %1445 = vpow2.f32 %v496_v21  ;;  %v1748_v21 = vld [vmem:[%s378_s22] sm:$0xff]  ;;  %s1217_s22 = scalar_lea.hbm %s1956_s9, %s1380_s28 }
 0x19e   : > { %s1221_s25 = sshll.u32 %s1217_s22, 4  ;;  %s1222_s25 = int_to_ptr.hbm [resolvable:$true] %s1221_s25 }
 0x19f   : > { %s1489_s16 = sshra.s32 %s1222_s25, 4  ;;  %s1490_s16 = int_to_ptr.hbm [resolvable:$true] %s1489_s16 }
 0x1a0   : > { %s1491_s28 = scalar_lea.hbm %s1490_s16, 8  ;;  %p1496_p0 = scmp.lt.s32.totalorder %s1490_s16, %s1956_s9 }
 0x1a1   : > { %p1492_p11 = scmp.ne.s32.totalorder %s1490_s16, %s1491_s28  ;;  %p1497_p1 = scmp.lt.s32.totalorder %s1495_s27, %s1491_s28 }
 0x1a3   : > { %v1446_v22 = vpop.eup %1445  ;;  %p1493_p12 = pnand %p1492_p11, %p1628_p5  ;;  %p1498_p2 = por %p1497_p1, %p1496_p0 }
 0x1a4   : > { %v498_v23 = vsel %vm491_vm2, %v1446_v22, 0.0 }
 0x1a5   : > { %499 = vadd.xlane.f32.xlu0 %v498_v23  ;;  %p1494_p13 = pneg %p1493_p12 }
 0x1a7   : > { %p1499_p3 = pnand %p1498_p2, %p1494_p13 }
 0x218   : > { %v500_v24 = vpop.xlane.xlu0 %499 }
 0x219   : > { %1447 = vrcp.f32 %v500_v24  ;;  %v512_v28 = vand.u32 2147483648, %v500_v24  ;;  %v510_v30 = vand.u32 2147483647, %v500_v24  ;;  %vm506_vm4 = vweird.f32 %v500_v24 }
 0x21a   : > { %1449 = vrcp.f32 %v1539_v41 }
 0x21b   : > { %v513_v32 = vor.u32 1.1754944e-38, %v512_v28  ;;  %vm511_vm6 = vcmp.eq.f32.partialorder %v510_v30, 8.507059e+37 }
 0x21f   : > { %v1448_v25 = vpop.eup %1447 }
 0x220   : > { %v502_v26 = vmul.f32 %v1448_v25, %v500_v24  ;;  %vm507_vm3 = vweird.f32 %v1448_v25  ;;  %v1450_v42 = vpop.eup %1449 }
 0x221   : > { %vm508_vm5 = vmor %vm506_vm4, %vm507_vm3  ;;  %v543_v43 = vmul.f32 32.0, %v1450_v42  ;;  %vm547_vm7 = vweird.f32 %v1450_v42 }
 0x222   : > { %v503_v27 = vsub.f32 1.0, %v502_v26 }
 0x223   : > { %v544_v44 = vsub.f32 1.0, %v543_v43 }
 0x224   : > { %v504_v29 = vmul.f32 %v1448_v25, %v503_v27 }
 0x225   : > { %v545_v45 = vmul.f32 %v1450_v42, %v544_v44 }
 0x226   : > { %v505_v31 = vadd.f32 %v1448_v25, %v504_v29 }
 0x227   : > { %v546_v46 = vadd.f32 %v1450_v42, %v545_v45 }
 0x228   : > { %v509_v33 = vsel %vm508_vm5, %v1448_v25, %v505_v31 }
 0x229   : > { %v514_v34 = vsel %vm511_vm6, %v513_v32, %v509_v33  ;;  %v1705_v51 = vsel %vm547_vm7, %v1450_v42, %v546_v46 }
 0x22a   : > { %v515_v35 = vmul.f32 %v1446_v22, %v514_v34 }
 0x22c   : > { %1330 = vmatmul.msk.f32.vlgmr.msra.gmra.mxu3 %vm491_vm2, %v515_v35 }
 0x22d   : > { %755 = vmatpush.msra.mxu3 %v406_v47 }
 0x2af   : > { %v536_v36 = vpop.f32.mrf.mxu3 }
 0x2b0   : > { %v537_v37 = vadd.f32 %v536_v36, %v379_v8  ;;  %v1425_v8 = vld [vmem:[%s1955_s8] ss:$0 sm:$0xff] }
 0x2b2   : > { %v539_v38 = vsel %vm417_vm0, %v537_v37, 0.0  ;;  %v550_v39 = vmul.f32 %v537_v37, %v537_v37 }
 0x2b3   : > { %540 = vadd.xlane.f32.xlu1 %v539_v38 }
 0x2b4   : > { %v551_v40 = vsel %vm417_vm0, %v550_v39, 0.0 }
 0x2bb   : > { %552 = vadd.xlane.f32.xlu1 %v551_v40 }
 0x326   : > { %v541_v48 = vpop.xlane.xlu1 %540 }
 0x327   : > { %v549_v57 = vmul.f32 %v1705_v51, %v541_v48  ;;  %v405_v48 = vld [vmem:[%s1953_s6 + $0x10] sm:$0xff] }
 0x328   : > { %756 = vmatpush.msra.mxu3 %v405_v48 }
 0x329   : > { %v555_v60 = vmul.f32 %v549_v57, %v549_v57  ;;  %v558_v7 = vsub.f32 %v537_v37, %v549_v57 }
 0x32a   : > { %757 = vmatpush.msra.mxu3 %v404_v49  ;;  %v1434_v49 = vld [vmem:[%s1952_s5 + $0x5] ss:$0 sm:$0xff] }
 0x32c   : > { %758 = vmatpush.msra.mxu3 %v403_v50 }
 0x32e   : > { %v553_v59 = vpop.xlane.xlu1 %552 }
 0x32f   : > { %v554_v61 = vmul.f32 %v553_v59, %v1705_v51 }
 0x331   : > { %v556_v62 = vsub.f32 %v554_v61, %v555_v60 }
 0x333   : > { %v557_v63 = vmax.f32 %v556_v62, 0.0 }
 0x335   : > { %v559_v0 = vadd.f32 1e-05, %v557_v63 }
 0x337   : > { %1451 = vrsqrt.f32 %v559_v0  ;;  %vm566_vm9 = vweird.f32 %v559_v0 }
 0x33d   : > { %v1452_v1 = vpop.eup %1451 }
 0x33e   : > { %v561_v2 = vmul.f32 %v1452_v1, %v559_v0  ;;  %vm567_vm8 = vweird.f32 %v1452_v1 }
 0x33f   : > { %vm568_vm10 = vmor %vm566_vm9, %vm567_vm8 }
 0x340   : > { %v562_v3 = vmul.f32 %v1452_v1, %v561_v2 }
 0x342   : > { %v563_v4 = vmul.f32 0.5, %v562_v3 }
 0x344   : > { %v564_v5 = vsub.f32 1.5, %v563_v4  ;;  %v1429_v4 = vld [vmem:[%s1955_s8 + $0x2] ss:$0 sm:$0xff] }
 0x346   : > { %v565_v6 = vmul.f32 %v1452_v1, %v564_v5 }
 0x348   : > { %v569_v9 = vsel %vm568_vm10, %v1452_v1, %v565_v6 }
 0x349   : > { %v570_v10 = vmul.f32 %v569_v9, %v558_v7  ;;  %v1430_v7 = vld [vmem:[%s1955_s8 + $0x3] ss:$0 sm:$0xff] }
 0x34b   : > { %v574_v12 = vmul.f32 %v1425_v8, %v570_v10  ;;  %v1431_v10 = vld [vmem:[%s1954_s7] ss:$0 sm:$0xff] }
 0x34d   : > { %v578_v13 = vadd.f32 %v1426_v11, %v574_v12 }
 0x34f   : > { %1331 = vmatmul.msk.f32.vlgmr.msrb.gmra.mxu3 %vm417_vm0, %v578_v13 }
 0x3d2   : > { %v602_v19 = vpop.f32.mrf.mxu3 }
 0x3d3   : > { %v603_v20 = vadd.f32 %v1428_v18, %v602_v19  ;;  %v1340_v19 = vld [vmem:[%s1951_s4 + $0x98] sm:$0xff] }
 0x3d4   : > { %852 = vmatpush.msra.mxu2 %v1340_v19  ;;  %v1352_v19 = vld [vmem:[%s1951_s4 + $0xf8] sm:$0xff] }
 0x3d5   : > { %1334 = vmatmul.msk.f32.vlgmr.msrb.gmra.mxu0 %vm464_vm1, %v603_v20  ;;  %v1344_v20 = vld [vmem:[%s1951_s4 + $0xb8] sm:$0xff] }
 0x3d6   : > { %875 = vmatpush.msra.mxu0 %v1344_v20  ;;  %v1347_v20 = vld [vmem:[%s1951_s4 + $0xd0] sm:$0xff] }
 0x452   : > { %v654_v22 = vpop.f32.mrf.mxu0 }
 0x453   : > { %v655_v23 = vadd.f32 %v654_v22, %v1748_v21  ;;  %v1339_v22 = vld [vmem:[%s1951_s4 + $0x90] sm:$0xff] }
 0x454   : > { %853 = vmatpush.msra.mxu2 %v1339_v22  ;;  %v1351_v22 = vld [vmem:[%s1951_s4 + $0xf0] sm:$0xff] }
 0x455   : > { %v657_v24 = vsel %vm491_vm2, %v655_v23, -inf }
 0x456   : > { %658 = vmax.xlane.f32.xlu2 %v657_v24  ;;  %v1338_v24 = vld [vmem:[%s1951_s4 + $0x88] sm:$0xff] }
 0x457   : > { %854 = vmatpush.msra.mxu2 %v1338_v24  ;;  %v1350_v24 = vld [vmem:[%s1951_s4 + $0xe8] sm:$0xff] }
 0x4c9   : > { %v659_v25 = vpop.xlane.xlu2 %658 }
 0x4ca   : > { %v660_v26 = vsub.f32 %v655_v23, %v659_v25  ;;  %v1343_v23 = vld [vmem:[%s1951_s4 + $0xb0] sm:$0xff]  ;;  %v1342_v25 = vld [vmem:[%s1951_s4 + $0xa8] sm:$0xff] }
 0x4cb   : > { %876 = vmatpush.msra.mxu0 %v1343_v23  ;;  %v1346_v23 = vld [vmem:[%s1951_s4 + $0xc8] sm:$0xff] }
 0x4cc   : > { %v661_v27 = vmul.f32 1.442695, %v660_v26  ;;  %v1337_v26 = vld [vmem:[%s1951_s4 + $0x80] sm:$0xff] }
 0x4cd   : > { %877 = vmatpush.msra.mxu0 %v1342_v25  ;;  %855 = vmatpush.msra.mxu2 %v1337_v26  ;;  %v1345_v26 = vld [vmem:[%s1951_s4 + $0xc0] sm:$0xff] }
 0x4ce   : > { %1453 = vpow2.f32 %v661_v27  ;;  %v1341_v27 = vld [vmem:[%s1951_s4 + $0xa0] sm:$0xff] }
 0x4cf   : > { %878 = vmatpush.msra.mxu0 %v1341_v27 }
 0x4d1   : > { %1030 = vmatpush.msrb.mxu0 %v1352_v19  ;;  %v1357_v19 = vld [vmem:[%s1953_s6 + $0x20] sm:$0xff] }
 0x4d3   : > { %1031 = vmatpush.msrb.mxu0 %v1351_v22 }
 0x4d4   : > { %v1454_v28 = vpop.eup %1453 }
 0x4d5   : > { %v663_v29 = vsel %vm491_vm2, %v1454_v28, 0.0  ;;  %1032 = vmatpush.msrb.mxu0 %v1350_v24 }
 0x4d6   : > { %664 = vadd.xlane.f32.xlu2 %v663_v29 }
 0x549   : > { %v665_v30 = vpop.xlane.xlu2 %664 }
 0x54a   : > { %1455 = vrcp.f32 %v665_v30  ;;  %v677_v34 = vand.u32 2147483648, %v665_v30  ;;  %v675_v36 = vand.u32 2147483647, %v665_v30  ;;  %vm671_vm12 = vweird.f32 %v665_v30 }
 0x54c   : > { %v678_v38 = vor.u32 1.1754944e-38, %v677_v34  ;;  %vm676_vm14 = vcmp.eq.f32.partialorder %v675_v36, 8.507059e+37 }
 0x550   : > { %v1456_v31 = vpop.eup %1455 }
 0x551   : > { %v667_v32 = vmul.f32 %v1456_v31, %v665_v30  ;;  %vm672_vm11 = vweird.f32 %v1456_v31 }
 0x552   : > { %vm673_vm13 = vmor %vm671_vm12, %vm672_vm11 }
 0x553   : > { %v668_v33 = vsub.f32 1.0, %v667_v32 }
 0x555   : > { %v669_v35 = vmul.f32 %v1456_v31, %v668_v33 }
 0x557   : > { %v670_v37 = vadd.f32 %v1456_v31, %v669_v35 }
 0x559   : > { %v674_v39 = vsel %vm673_vm13, %v1456_v31, %v670_v37 }
 0x55a   : > { %v679_v40 = vsel %vm676_vm14, %v678_v38, %v674_v39 }
 0x55b   : > { %v680_v41 = vmul.f32 %v1454_v28, %v679_v40 }
 0x55d   : > { %1335 = vmatmul.msk.f32.vlgmr.msrb.gmra.mxu1 %vm491_vm2, %v680_v41 }
 0x5da   : > { %v701_v42 = vpop.f32.mrf.mxu1 }
 0x5db   : > { %v702_v43 = vadd.f32 %v701_v42, %v578_v13 }
 0x5dd   : > { %v704_v44 = vsel %vm417_vm0, %v702_v43, 0.0  ;;  %v708_v45 = vmul.f32 %v702_v43, %v702_v43 }
 0x5de   : > { %705 = vadd.xlane.f32.xlu0 %v704_v44 }
 0x5df   : > { %v709_v46 = vsel %vm417_vm0, %v708_v45, 0.0 }
 0x5e0   : > { %710 = vadd.xlane.f32.xlu1 %v709_v46  ;;  %v1433_v46 = vld [vmem:[%s1955_s8 + $0x5] ss:$0 sm:$0xff] }
 0x651   : > { %v706_v52 = vpop.xlane.xlu0 %705 }
 0x652   : > { %v707_v53 = vmul.f32 %v706_v52, %v1705_v51 }
 0x653   : > { %v711_v55 = vpop.xlane.xlu1 %710 }
 0x654   : > { %v713_v56 = vmul.f32 %v707_v53, %v707_v53  ;;  %v712_v57 = vmul.f32 %v711_v55, %v1705_v51  ;;  %v716_v3 = vsub.f32 %v702_v43, %v707_v53  ;;  %v1432_v43 = vld [vmem:[%s1955_s8 + $0x4] ss:$0 sm:$0xff] }
 0x655   : > { %v1435_v53 = vld [vmem:[%s1952_s5 + $0x4] ss:$0 sm:$0xff] }
 0x656   : > { %v714_v58 = vsub.f32 %v712_v57, %v713_v56 }
 0x658   : > { %v715_v59 = vmax.f32 %v714_v58, 0.0 }
 0x65a   : > { %v717_v60 = vadd.f32 1e-05, %v715_v59 }
 0x65c   : > { %1457 = vrsqrt.f32 %v717_v60  ;;  %vm724_vm3 = vweird.f32 %v717_v60 }
 0x662   : > { %v1458_v61 = vpop.eup %1457 }
 0x663   : > { %v719_v62 = vmul.f32 %v1458_v61, %v717_v60  ;;  %vm725_vm15 = vweird.f32 %v1458_v61 }
 0x664   : > { %vm726_vm4 = vmor %vm724_vm3, %vm725_vm15 }
 0x665   : > { %v720_v63 = vmul.f32 %v1458_v61, %v719_v62 }
 0x667   : > { %v721_v0 = vmul.f32 0.5, %v720_v63 }
 0x669   : > { %v722_v1 = vsub.f32 1.5, %v721_v0 }
 0x66b   : > { %v723_v2 = vmul.f32 %v1458_v61, %v722_v1 }
 0x66d   : > { %v727_v5 = vsel %vm726_vm4, %v1458_v61, %v723_v2 }
 0x66e   : > { %v728_v6 = vmul.f32 %v727_v5, %v716_v3 }
 0x670   : > { %v732_v8 = vmul.f32 %v1429_v4, %v728_v6 }
 0x672   : > { %v736_v9 = vadd.f32 %v1430_v7, %v732_v8 }
 0x674   : > { %1336 = vmatmul.msk.f32.vlgmr.msra.gmra.mxu3 %vm417_vm0, %v736_v9 }
 0x6f7   : > { %v760_v11 = vpop.f32.mrf.mxu3 }
 0x6f8   : > { %v761_v12 = vadd.f32 %v1431_v10, %v760_v11 }
 0x6fa   : > { %v763_v13 = vmax.f32 %v761_v12, 0.0 }
 0x6fc   : > { %v764_v14 = vadd.f32 %v763_v13, %v736_v9 }
 0x6fe   : > { %v765_v16 = vsel %vm417_vm0, %v764_v14, 0.0  ;;  %v769_v17 = vmul.f32 %v764_v14, %v764_v14 }
 0x6ff   : > { %766 = vadd.xlane.f32.xlu2 %v765_v16 }
 0x700   : > { %v770_v18 = vsel %vm417_vm0, %v769_v17, 0.0 }
 0x701   : > { %771 = vadd.xlane.f32.xlu0 %v770_v18  ;;  %v1348_v18 = vld [vmem:[%s1951_s4 + $0xd8] sm:$0xff] }
 0x702   : > { %1007 = vmatpush.msrb.mxu2 %v1348_v18 }
 0x704   : > { %1008 = vmatpush.msrb.mxu2 %v1347_v20 }
 0x706   : > { %1009 = vmatpush.msrb.mxu2 %v1346_v23 }
 0x708   : > { %1010 = vmatpush.msrb.mxu2 %v1345_v26 }
 0x772   : > { %v767_v28 = vpop.xlane.xlu2 %766 }
 0x773   : > { %v768_v29 = vmul.f32 %v767_v28, %v1705_v51  ;;  %v1349_v28 = vld [vmem:[%s1951_s4 + $0xe0] sm:$0xff] }
 0x774   : > { %v772_v30 = vpop.xlane.xlu0 %771  ;;  %1033 = vmatpush.msrb.mxu0 %v1349_v28 }
 0x775   : > { %v774_v31 = vmul.f32 %v768_v29, %v768_v29  ;;  %v773_v32 = vmul.f32 %v772_v30, %v1705_v51  ;;  %v777_v42 = vsub.f32 %v764_v14, %v768_v29 }
 0x777   : > { %v775_v33 = vsub.f32 %v773_v32, %v774_v31 }
 0x779   : > { %v776_v34 = vmax.f32 %v775_v33, 0.0 }
 0x77b   : > { %v778_v35 = vadd.f32 1e-05, %v776_v34 }
 0x77d   : > { %1459 = vrsqrt.f32 %v778_v35  ;;  %vm785_vm6 = vweird.f32 %v778_v35 }
 0x783   : > { %v1460_v36 = vpop.eup %1459 }
 0x784   : > { %v780_v37 = vmul.f32 %v1460_v36, %v778_v35  ;;  %vm786_vm5 = vweird.f32 %v1460_v36 }
 0x785   : > { %vm787_vm7 = vmor %vm785_vm6, %vm786_vm5 }
 0x786   : > { %v781_v38 = vmul.f32 %v1460_v36, %v780_v37 }
 0x788   : > { %v782_v39 = vmul.f32 0.5, %v781_v38 }
 0x78a   : > { %v783_v40 = vsub.f32 1.5, %v782_v39 }
 0x78c   : > { %v784_v41 = vmul.f32 %v1460_v36, %v783_v40 }
 0x78e   : > { %v788_v44 = vsel %vm787_vm7, %v1460_v36, %v784_v41 }
 0x78f   : > { %v789_v45 = vmul.f32 %v788_v44, %v777_v42  ;;  %v1436_v42 = vld [vmem:[%s1955_s8 + $0x6] ss:$0 sm:$0xff] }
 0x791   : > { %v793_v47 = vmul.f32 %v1432_v43, %v789_v45 }
 0x793   : > { %v797_v48 = vadd.f32 %v1433_v46, %v793_v47  ;;  %v1438_v47 = vld [vmem:[%s1952_s5 + $0x7] ss:$0 sm:$0xff] }
 0x795   : > { %1368 = vmatmul.msk.f32.vlgmr.msra.gmra.mxu2 %vm417_vm0, %v797_v48  ;;  %1369 = vmatmul.msk.f32.vlgmr.msra.gmra.mxu0 %vm417_vm0, %v797_v48 }
 0x796   : > { %951 = vmatpush.msrb.mxu3 %v797_v48 }
 0x798   : > { %1106 = vmatpush.msra.mxu3 %v1713_v54 }
 0x79d   : > { %1374 = vmatmul.msk.f32.vlgmr.msrb.gmra.mxu0 %vm417_vm0, %v1713_v54  ;;  %v1437_v54 = vld [vmem:[%s1955_s8 + $0x7] ss:$0 sm:$0xff] }
 0x812   : > { %v880_v50 = vpop.f32.mrf.mxu0 }
 0x813   : > { %v881_v52 = vadd.f32 %v1434_v49, %v880_v50  ;;  %v1439_v50 = vld [vmem:[%s1952_s5 + $0x6] ss:$0 sm:$0xff] }
 0x815   : > { %1370 = vmatpush.xpose.msk.msra.mxu1 %vm464_vm1, %v881_v52 }
 0x818   : > { %v857_v55 = vpop.f32.mrf.mxu2 }
 0x819   : > { %v858_v56 = vadd.f32 %v1435_v53, %v857_v55 }
 0x81b   : > { %1371 = vmatmul.msk.f32.vlgmr.msra.gmra.mxu1 %vm464_vm1, %v858_v56 }
 0x898   : > { %v906_v57 = vpop.f32.mrf.mxu1 }
 0x899   : > { %v907_v58 = vadd.f32 %v906_v57, %v1684_v15 }
 0x89b   : > { %v909_v59 = vsel %vm491_vm2, %v907_v58, -inf }
 0x89c   : > { %910 = vmax.xlane.f32.xlu1 %v909_v59 }
 0x90f   : > { %v911_v60 = vpop.xlane.xlu1 %910 }
 0x910   : > { %v912_v61 = vsub.f32 %v907_v58, %v911_v60 }
 0x912   : > { %v913_v62 = vmul.f32 1.442695, %v912_v61 }
 0x914   : > { %1461 = vpow2.f32 %v913_v62 }
 0x91a   : > { %v1462_v63 = vpop.eup %1461 }
 0x91b   : > { %v915_v0 = vsel %vm491_vm2, %v1462_v63, 0.0 }
 0x91c   : > { %916 = vadd.xlane.f32.xlu2 %v915_v0 }
 0x98f   : > { %v917_v1 = vpop.xlane.xlu2 %916 }
 0x990   : > { %1463 = vrcp.f32 %v917_v1  ;;  %v929_v5 = vand.u32 2147483648, %v917_v1  ;;  %v927_v15 = vand.u32 2147483647, %v917_v1  ;;  %vm923_vm9 = vweird.f32 %v917_v1 }
 0x992   : > { %v930_v8 = vor.u32 1.1754944e-38, %v929_v5  ;;  %vm928_vm11 = vcmp.eq.f32.partialorder %v927_v15, 8.507059e+37 }
 0x996   : > { %v1464_v2 = vpop.eup %1463 }
 0x997   : > { %v919_v3 = vmul.f32 %v1464_v2, %v917_v1  ;;  %vm924_vm8 = vweird.f32 %v1464_v2 }
 0x998   : > { %vm925_vm10 = vmor %vm923_vm9, %vm924_vm8 }
 0x999   : > { %v920_v4 = vsub.f32 1.0, %v919_v3 }
 0x99b   : > { %v921_v6 = vmul.f32 %v1464_v2, %v920_v4 }
 0x99d   : > { %v922_v7 = vadd.f32 %v1464_v2, %v921_v6 }
 0x99f   : > { %v926_v9 = vsel %vm925_vm10, %v1464_v2, %v922_v7 }
 0x9a0   : > { %v931_v10 = vsel %vm928_vm11, %v930_v8, %v926_v9 }
 0x9a1   : > { %v932_v11 = vmul.f32 %v1462_v63, %v931_v10 }
 0x9a3   : > { %1372 = vmatmul.msk.f32.vlgmr.msrb.gmra.mxu3 %vm491_vm2, %v932_v11 }
 0xa26   : > { %v953_v12 = vpop.f32.mrf.mxu3 }
 0xa27   : > { %v954_v13 = vadd.f32 %v953_v12, %v797_v48  ;;  %v1035_v48 = vpop.f32.mrf.mxu0 }
 0xa28   : > { %v1036_v49 = vadd.f32 %v1438_v47, %v1035_v48 }
 0xa29   : > { %v956_v14 = vsel %vm417_vm0, %v954_v13, 0.0  ;;  %v960_v16 = vmul.f32 %v954_v13, %v954_v13 }
 0xa2a   : > { %957 = vadd.xlane.f32.xlu0 %v956_v14  ;;  %1375 = vmatpush.xpose.msk.msrb.mxu1 %vm464_vm1, %v1036_v49  ;;  %v1360_v14 = vld [vmem:[%s1953_s6 + $0x38] sm:$0xff] }
 0xa2b   : > { %v961_v17 = vsel %vm417_vm0, %v960_v16, 0.0  ;;  %1162 = vmatpush.msra.mxu2 %v1360_v14  ;;  %v1359_v16 = vld [vmem:[%s1953_s6 + $0x30] sm:$0xff] }
 0xa2c   : > { %962 = vadd.xlane.f32.xlu1 %v961_v17  ;;  %v1358_v17 = vld [vmem:[%s1953_s6 + $0x28] sm:$0xff] }
 0xa2d   : > { %1163 = vmatpush.msra.mxu2 %v1359_v16 }
 0xa2f   : > { %1164 = vmatpush.msra.mxu2 %v1358_v17 }
 0xa31   : > { %1165 = vmatpush.msra.mxu2 %v1357_v19 }
 0xa9d   : > { %v958_v25 = vpop.xlane.xlu0 %957 }
 0xa9e   : > { %v959_v27 = vmul.f32 %v958_v25, %v1705_v51 }
 0xa9f   : > { %v963_v29 = vpop.xlane.xlu1 %962 }
 0xaa0   : > { %v965_v30 = vmul.f32 %v959_v27, %v959_v27  ;;  %v964_v31 = vmul.f32 %v963_v29, %v1705_v51  ;;  %v968_v41 = vsub.f32 %v954_v13, %v959_v27 }
 0xaa2   : > { %v966_v32 = vsub.f32 %v964_v31, %v965_v30 }
 0xaa4   : > { %v967_v33 = vmax.f32 %v966_v32, 0.0 }
 0xaa6   : > { %v969_v34 = vadd.f32 1e-05, %v967_v33 }
 0xaa8   : > { %1465 = vrsqrt.f32 %v969_v34  ;;  %vm976_vm13 = vweird.f32 %v969_v34 }
 0xaae   : > { %v1466_v35 = vpop.eup %1465 }
 0xaaf   : > { %v971_v36 = vmul.f32 %v1466_v35, %v969_v34  ;;  %vm977_vm12 = vweird.f32 %v1466_v35 }
 0xab0   : > { %vm978_vm14 = vmor %vm976_vm13, %vm977_vm12 }
 0xab1   : > { %v972_v37 = vmul.f32 %v1466_v35, %v971_v36 }
 0xab3   : > { %v973_v38 = vmul.f32 0.5, %v972_v37 }
 0xab5   : > { %v974_v39 = vsub.f32 1.5, %v973_v38  ;;  %v1441_v38 = vld [vmem:[%s1955_s8 + $0x9] ss:$0 sm:$0xff] }
 0xab7   : > { %v975_v40 = vmul.f32 %v1466_v35, %v974_v39 }
 0xab9   : > { %v979_v43 = vsel %vm978_vm14, %v1466_v35, %v975_v40  ;;  %v1440_v35 = vld [vmem:[%s1955_s8 + $0x8] ss:$0 sm:$0xff] }
 0xaba   : > { %v980_v44 = vmul.f32 %v979_v43, %v968_v41  ;;  %v1442_v41 = vld [vmem:[%s1954_s7 + $0x1] ss:$0 sm:$0xff] }
 0xabc   : > { %v984_v45 = vmul.f32 %v1436_v42, %v980_v44 }
 0xabe   : > { %v988_v46 = vadd.f32 %v1437_v54, %v984_v45 }
 0xac0   : > { %1373 = vmatmul.msk.f32.vlgmr.msrb.gmra.mxu2 %vm417_vm0, %v988_v46 }
 0xb43   : > { %v1012_v52 = vpop.f32.mrf.mxu2 }
 0xb44   : > { %v1013_v53 = vadd.f32 %v1439_v50, %v1012_v52 }
 0xb46   : > { %1376 = vmatmul.msk.f32.vlgmr.msrb.gmra.mxu1 %vm464_vm1, %v1013_v53 }
 0xbc3   : > { %v1061_v55 = vpop.f32.mrf.mxu1 }
 0xbc4   : > { %v1062_v56 = vadd.f32 %v1061_v55, %v1748_v21 }
 0xbc6   : > { %v1064_v57 = vsel %vm491_vm2, %v1062_v56, -inf }
 0xbc7   : > { %1065 = vmax.xlane.f32.xlu2 %v1064_v57 }
 0xc3a   : > { %v1066_v58 = vpop.xlane.xlu2 %1065 }
 0xc3b   : > { %v1067_v59 = vsub.f32 %v1062_v56, %v1066_v58 }
 0xc3d   : > { %v1068_v60 = vmul.f32 1.442695, %v1067_v59 }
 0xc3f   : > { %1467 = vpow2.f32 %v1068_v60 }
 0xc45   : > { %v1468_v61 = vpop.eup %1467 }
 0xc46   : > { %v1070_v62 = vsel %vm491_vm2, %v1468_v61, 0.0 }
 0xc47   : > { %1071 = vadd.xlane.f32.xlu0 %v1070_v62 }
 0xcba   : > { %v1072_v63 = vpop.xlane.xlu0 %1071 }
 0xcbb   : > { %1469 = vrcp.f32 %v1072_v63  ;;  %v1084_v3 = vand.u32 2147483648, %v1072_v63  ;;  %v1082_v21 = vand.u32 2147483647, %v1072_v63  ;;  %vm1078_vm15 = vweird.f32 %v1072_v63 }
 0xcbd   : > { %v1085_v6 = vor.u32 1.1754944e-38, %v1084_v3  ;;  %vm1083_vm4 = vcmp.eq.f32.partialorder %v1082_v21, 8.507059e+37  ;;  %v1444_v3 = vld [vmem:[%s1955_s8 + $0xb] ss:$0 sm:$0xff] }
 0xcc1   : > { %v1470_v0 = vpop.eup %1469 }
 0xcc2   : > { %v1074_v1 = vmul.f32 %v1470_v0, %v1072_v63  ;;  %vm1079_vm1 = vweird.f32 %v1470_v0 }
 0xcc3   : > { %vm1080_vm3 = vmor %vm1078_vm15, %vm1079_vm1 }
 0xcc4   : > { %v1075_v2 = vsub.f32 1.0, %v1074_v1 }
 0xcc6   : > { %v1076_v4 = vmul.f32 %v1470_v0, %v1075_v2 }
 0xcc8   : > { %v1077_v5 = vadd.f32 %v1470_v0, %v1076_v4 }
 0xcca   : > { %v1081_v15 = vsel %vm1080_vm3, %v1470_v0, %v1077_v5 }
 0xccb   : > { %v1086_v7 = vsel %vm1083_vm4, %v1085_v6, %v1081_v15 }
 0xccc   : > { %v1087_v8 = vmul.f32 %v1468_v61, %v1086_v7 }
 0xcce   : > { %1377 = vmatmul.msk.f32.vlgmr.msra.gmra.mxu3 %vm491_vm2, %v1087_v8 }
 0xd51   : > { %v1108_v9 = vpop.f32.mrf.mxu3 }
 0xd52   : > { %v1109_v10 = vadd.f32 %v1108_v9, %v988_v46 }
 0xd54   : > { %v1111_v11 = vsel %vm417_vm0, %v1109_v10, 0.0  ;;  %v1115_v12 = vmul.f32 %v1109_v10, %v1109_v10 }
 0xd55   : > { %1112 = vadd.xlane.f32.xlu1 %v1111_v11 }
 0xd56   : > { %v1116_v13 = vsel %vm417_vm0, %v1115_v12, 0.0 }
 0xd57   : > { %1117 = vadd.xlane.f32.xlu2 %v1116_v13 }
 0xdc8   : > { %v1113_v18 = vpop.xlane.xlu1 %1112 }
 0xdc9   : > { %v1114_v20 = vmul.f32 %v1113_v18, %v1705_v51 }
 0xdca   : > { %v1118_v22 = vpop.xlane.xlu2 %1117 }
 0xdcb   : > { %v1120_v23 = vmul.f32 %v1114_v20, %v1114_v20  ;;  %v1119_v24 = vmul.f32 %v1118_v22, %v1705_v51  ;;  %v1123_v34 = vsub.f32 %v1109_v10, %v1114_v20 }
 0xdcd   : > { %v1121_v25 = vsub.f32 %v1119_v24, %v1120_v23 }
 0xdcf   : > { %v1122_v26 = vmax.f32 %v1121_v25, 0.0 }
 0xdd1   : > { %v1124_v27 = vadd.f32 1e-05, %v1122_v26 }
 0xdd3   : > { %1471 = vrsqrt.f32 %v1124_v27  ;;  %vm1131_vm5 = vweird.f32 %v1124_v27 }
 0xdd9   : > { %v1472_v28 = vpop.eup %1471 }
 0xdda   : > { %v1126_v29 = vmul.f32 %v1472_v28, %v1124_v27  ;;  %vm1132_vm2 = vweird.f32 %v1472_v28 }
 0xddb   : > { %vm1133_vm6 = vmor %vm1131_vm5, %vm1132_vm2 }
 0xddc   : > { %v1127_v30 = vmul.f32 %v1472_v28, %v1126_v29 }
 0xdde   : > { %v1128_v31 = vmul.f32 0.5, %v1127_v30 }
 0xde0   : > { %v1129_v32 = vsub.f32 1.5, %v1128_v31 }
 0xde2   : > { %v1130_v33 = vmul.f32 %v1472_v28, %v1129_v32 }
 0xde4   : > { %v1134_v36 = vsel %vm1133_vm6, %v1472_v28, %v1130_v33 }
 0xde5   : > { %v1135_v37 = vmul.f32 %v1134_v36, %v1123_v34 }
 0xde7   : > { %v1139_v39 = vmul.f32 %v1440_v35, %v1135_v37 }
 0xde9   : > { %v1143_v40 = vadd.f32 %v1441_v38, %v1139_v39 }
 0xdeb   : > { %1378 = vmatmul.msk.f32.vlgmr.msra.gmra.mxu2 %vm417_vm0, %v1143_v40 }
 0xe6e   : > { %v1167_v42 = vpop.f32.mrf.mxu2 }
 0xe6f   : > { %v1168_v43 = vadd.f32 %v1442_v41, %v1167_v42 }
 0xe71   : > { %v1170_v44 = vmax.f32 %v1168_v43, 0.0 }
 0xe73   : > { %v1171_v54 = vadd.f32 %v1170_v44, %v1143_v40 }
 0xe75   : > { %v1172_v45 = vsel %vm417_vm0, %v1171_v54, 0.0  ;;  %v1176_v46 = vmul.f32 %v1171_v54, %v1171_v54 }
 0xe76   : > { %1173 = vadd.xlane.f32.xlu0 %v1172_v45 }
 0xe77   : > { %v1177_v47 = vsel %vm417_vm0, %v1176_v46, 0.0 }
 0xe78   : > { %1178 = vadd.xlane.f32.xlu1 %v1177_v47 }
 0xee9   : > { %v1174_v48 = vpop.xlane.xlu0 %1173 }
 0xeea   : > { %v1175_v49 = vmul.f32 %v1174_v48, %v1705_v51 }
 0xeeb   : > { %v1179_v50 = vpop.xlane.xlu1 %1178 }
 0xeec   : > { %v1181_v52 = vmul.f32 %v1175_v49, %v1175_v49  ;;  %v1180_v53 = vmul.f32 %v1179_v50, %v1705_v51  ;;  %v1184_v0 = vsub.f32 %v1171_v54, %v1175_v49  ;;  %v1443_v51 = vld [vmem:[%s1955_s8 + $0xa] ss:$0 sm:$0xff] }
 0xeee   : > { %v1182_v55 = vsub.f32 %v1180_v53, %v1181_v52 }
 0xef0   : > { %v1183_v56 = vmax.f32 %v1182_v55, 0.0 }
 0xef2   : > { %v1185_v57 = vadd.f32 1e-05, %v1183_v56 }
 0xef4   : > { %1473 = vrsqrt.f32 %v1185_v57  ;;  %vm1192_vm8 = vweird.f32 %v1185_v57 }
 0xefa   : > { %v1474_v58 = vpop.eup %1473 }
 0xefb   : > { %v1187_v59 = vmul.f32 %v1474_v58, %v1185_v57  ;;  %vm1193_vm7 = vweird.f32 %v1474_v58 }
 0xefc   : > { %vm1194_vm9 = vmor %vm1192_vm8, %vm1193_vm7 }
 0xefd   : > { %v1188_v60 = vmul.f32 %v1474_v58, %v1187_v59 }
 0xeff   : > { %v1189_v61 = vmul.f32 0.5, %v1188_v60 }
 0xf01   : > { %v1190_v62 = vsub.f32 1.5, %v1189_v61 }
 0xf03   : > { %v1191_v63 = vmul.f32 %v1474_v58, %v1190_v62 }
 0xf05   : > { %v1195_v1 = vsel %vm1194_vm9, %v1474_v58, %v1191_v63 }
 0xf06   : > { %v1196_v2 = vmul.f32 %v1195_v1, %v1184_v0 }
 0xf08   : > { %v1200_v4 = vmul.f32 %v1443_v51, %v1196_v2 }
 0xf0a   : > { %v1204_v21 = vadd.f32 %v1444_v3, %v1200_v4 }
 0xf0c   : > { %1205 = vst.msk [vmem:[%s362_s13] sm:$0xff] %vm417_vm0, %v1204_v21 }
 0xf0d   : > { %1502 = shalt.err (!%p1499_p3)
}
 0xf0e   : > { %1383 = dma.vmem_to_hbm [thread:$0]  (%p1628_p5), %s1220_s23, 128, %s1222_s25, %s1207_s29  }
 0xf0f PF: > { %p1389_p4 = scmp.ge.s32.totalorder %s1537_s12, 2  ;;  %s1233_s26 = sand.u32 1, %s1525_s30  }
 0xf10   : > { %s1234_s14 = scalar_lea.sflag [#allocation3], %s1233_s26 }
 0xf11   : > { %p1386_p7 = pnand %p1389_p4, %p1632_p6 }
 0xf13   : > { %p1387_p8 = pneg %p1386_p7 }
 0xf15   : > { %1520 = dma.done.wait (%p1387_p8), %s1234_s14, 128  }
 0xf16   : > { %1522 = vsyncadd (%p1387_p8), %s1234_s14, 4294967168  ;;  %p19_p9 = scmp.ge.s32.totalorder %s1615_s15, 4   ;;  %s1959_s30 = smov %s1529_s10 }
 0xf17   : > { %s1960_s10 = smov %s1533_s11  ;;  %s1961_s11 = smov %s1626_s18 }
 0xf18   : > { %s1962_s12 = smov %s1615_s15  ;;  %21 = sbr.rel (!%p19_p9) target bundleno = 3 (0x3), region = 105 }
 0xf1d   :  { %1240 = vsyncpa [#allocation3], 1 }
 0xf1e   :  { %1242 = vsyncpa [#allocation3 + $0x1], 1 }

</bundles_post_ra>
